<compile_context>
chip_gen: v7x
topology: tpu7x:2x2x1
jax: 0.10.0
libtpu: 0.0.40
codegen_flags: <defaults>
</compile_context>

<pallas_src>
import functools

import jax
import jax.numpy as jnp
from jax.experimental import pallas as pl
from jax.experimental.pallas import tpu as pltpu

N_EMBD = 256       # n_embd in the PyTorch module
BLOCK_SIZE = 128   # max causal-mask length (T <= BLOCK_SIZE)


def mha_fused_kernel(x_ref, wqkv_ref, wproj_ref, bproj_ref, o_ref,
                     *, num_heads, head_size, compute_dtype):
    """Fused multi-head attention for one batch element.

    x_ref    : (1, T, C)          current batch element (f32)
    wqkv_ref : (C, 3*H*Dh)        fused q|k|v projection weights (compute_dtype)
    wproj_ref: (C, C)             output projection weight, pre-transposed
    bproj_ref: (1, C)             output projection bias (f32)
    o_ref    : (1, T, C)          output slot (lane-dense, last dim = C = 256)
    """
    H, Dh = num_heads, head_size
    x = x_ref[0]                          # (T, C)
    T, C = x.shape
    scale = C ** (-0.5)                   # PyTorch uses n_embd (C), not head_size

    # One MXU-wide projection producing q|k|v for ALL heads: (T, 3*H*Dh).
    x_c = x.astype(compute_dtype)
    qkv = jnp.dot(x_c, wqkv_ref[...], preferred_element_type=jnp.float32)

    # Static causal mask, shared by every head.
    row = jax.lax.broadcasted_iota(jnp.int32, (T, T), 0)
    col = jax.lax.broadcasted_iota(jnp.int32, (T, T), 1)
    causal = col <= row

    head_outs = []
    for h in range(H):                    # H=4, unrolled at trace time
        q_h = qkv[:, h * Dh:(h + 1) * Dh]                    # (T, Dh)
        k_h = qkv[:, (H + h) * Dh:(H + h + 1) * Dh]          # (T, Dh)
        v_h = qkv[:, (2 * H + h) * Dh:(2 * H + h + 1) * Dh]  # (T, Dh)

        # Contract over Dh directly (q @ k.T without materializing k.T).
        scores = jax.lax.dot_general(
            q_h.astype(compute_dtype), k_h.astype(compute_dtype),
            (((1,), (1,)), ((), ())),
            preferred_element_type=jnp.float32) * scale      # (T, T)

        # masked_fill(tril == 0, -inf); large finite negative avoids NaN on
        # any fully-masked (padded) row while giving identical probabilities.
        scores = jnp.where(causal, scores, -1e30)

        # Numerically-stable softmax in f32; reciprocal on the EUP slot.
        m = jnp.max(scores, axis=-1, keepdims=True)
        p = jnp.exp(scores - m)
        p = p * pl.reciprocal(jnp.sum(p, axis=-1, keepdims=True), approx=True)

        head_outs.append(
            jnp.dot(p.astype(compute_dtype), v_h.astype(compute_dtype),
                    preferred_element_type=jnp.float32))     # (T, Dh)

    cat = jnp.concatenate(head_outs, axis=-1)                # (T, C) f32, in VMEM

    # Fused output projection + bias (dropout = identity).
    proj = jnp.dot(cat.astype(compute_dtype), wproj_ref[...],
                   preferred_element_type=jnp.float32) + bproj_ref[...]
    o_ref[0] = proj.astype(o_ref.dtype)


def multi_head_attention(x, wq, wk, wv, w_proj, b_proj,
                         *, compute_dtype=jnp.bfloat16):
    """x: (B, T, C); wq/wk/wv: (H, C, Dh) pre-transposed per-head weights;
    w_proj: (C, C) pre-transposed; b_proj: (1, C)."""
    B, T, C = x.shape
    H, _, Dh = wq.shape
    assert H * Dh == C

    # Fuse per-head projection weights into one lane-dense (C, 3*H*Dh) weight.
    def fuse(w):  # (H, C, Dh) -> (C, H*Dh)
        return jnp.transpose(w, (1, 0, 2)).reshape(C, H * Dh)

    wqkv = jnp.concatenate([fuse(wq), fuse(wk), fuse(wv)],
                           axis=-1).astype(compute_dtype)      # (C, 3*H*Dh)
    w_proj_c = w_proj.astype(compute_dtype)

    kernel = functools.partial(mha_fused_kernel, num_heads=H, head_size=Dh,
                               compute_dtype=compute_dtype)

    out = pl.pallas_call(
        kernel,
        out_shape=jax.ShapeDtypeStruct((B, T, C), x.dtype),
        grid=(B,),                                             # >=2 parallel points for v7x
        in_specs=[
            pl.BlockSpec((1, T, C), lambda b: (b, 0, 0)),      # x: changes per step (8 KiB)
            pl.BlockSpec((C, 3 * H * Dh), lambda b: (0, 0)),   # weights: block-invariant
            pl.BlockSpec((C, C), lambda b: (0, 0)),
            pl.BlockSpec((1, C), lambda b: (0, 0)),
        ],
        out_specs=pl.BlockSpec((1, T, C), lambda b: (b, 0, 0)),  # lane-dense (last dim 256)
        compiler_params=pltpu.CompilerParams(
            dimension_semantics=("parallel",)),
    )(x, wqkv, w_proj_c, b_proj)

    return out


def reference(x, wq, wk, wv, w_proj, b_proj):
    """Pure-JAX reference matching the PyTorch forward (dropout = identity)."""
    B, T, C = x.shape
    outs = []
    for h in range(wq.shape[0]):
        q = x @ wq[h]
        k = x @ wk[h]
        v = x @ wv[h]
        wei = q @ jnp.swapaxes(k, -1, -2) * C ** (-0.5)
        mask = jnp.tril(jnp.ones((T, T)))
        wei = jnp.where(mask == 0, -jnp.inf, wei)
        wei = jax.nn.softmax(wei, axis=-1)
        outs.append(wei @ v)
    cat = jnp.concatenate(outs, axis=-1)
    return cat @ w_proj + b_proj[0]


if __name__ == "__main__":
    key = jax.random.PRNGKey(0)
    B, T = 2, 8                 # small seq (<= block_size = 128)
    H, Dh = 4, 64               # num_heads * head_size = n_embd = 256
    ks = jax.random.split(key, 6)

    x = jax.random.normal(ks[0], (B, T, N_EMBD), jnp.float32)
    # deterministic synthetic parameters (Linear weights stored pre-transposed)
    wq = jax.random.normal(ks[1], (H, N_EMBD, Dh), jnp.float32) * 0.02
    wk = jax.random.normal(ks[2], (H, N_EMBD, Dh), jnp.float32) * 0.02
    wv = jax.random.normal(ks[3], (H, N_EMBD, Dh), jnp.float32) * 0.02
    w_proj = jax.random.normal(ks[4], (N_EMBD, N_EMBD), jnp.float32) * 0.02
    b_proj = jax.random.normal(ks[5], (1, N_EMBD), jnp.float32) * 0.02

    ref = reference(x, wq, wk, wv, w_proj, b_proj)

    # Strict check with f32 MXU inputs.
    out_f32 = multi_head_attention(x, wq, wk, wv, w_proj, b_proj,
                                   compute_dtype=jnp.float32)
    jax.block_until_ready(out_f32)
    assert out_f32.shape == (B, T, N_EMBD)
    assert jnp.allclose(out_f32, ref, atol=1e-3, rtol=1e-3), "f32 mismatch vs reference"

    # Default fast path: bf16 MXU inputs, f32 accumulation/softmax.
    out_bf16 = multi_head_attention(x, wq, wk, wv, w_proj, b_proj,
                                    compute_dtype=jnp.bfloat16)
    jax.block_until_ready(out_bf16)
    assert out_bf16.shape == (B, T, N_EMBD)
    assert jnp.allclose(out_bf16, ref, atol=2e-2, rtol=2e-2), "bf16 mismatch vs reference"

    print("KERNEL_OK")
</pallas_src>

<mosaic_0001>
module attributes {stable_mosaic.version = 11 : i64} {
  func.func @mha_fused_kernel(%arg0: i32, %arg1: memref<1x8x256xf32, #tpu.memory_space<vmem>>, %arg2: memref<256x768xf32, #tpu.memory_space<vmem>>, %arg3: memref<256x256xf32, #tpu.memory_space<vmem>>, %arg4: memref<1x256xf32, #tpu.memory_space<vmem>>, %arg5: memref<1x8x256xf32, #tpu.memory_space<vmem>>) attributes {dimension_semantics = [#tpu.dimension_semantics<parallel>], iteration_bounds = array<i64: 2>, scalar_prefetch = 0 : i64, scratch_operands = 0 : i64, tpu.core_type = #tpu.core_type<tc>, window_params = [{transform_indices = @transform_0, window_bounds = array<i64: 1, 8, 256>}, {pipeline_mode = #tpu.pipeline_mode<synchronous>, transform_indices = @transform_1, window_bounds = array<i64: 256, 768>}, {pipeline_mode = #tpu.pipeline_mode<synchronous>, transform_indices = @transform_2, window_bounds = array<i64: 256, 256>}, {pipeline_mode = #tpu.pipeline_mode<synchronous>, transform_indices = @transform_3, window_bounds = array<i64: 1, 256>}, {transform_indices = @transform_4, window_bounds = array<i64: 1, 8, 256>}]} {
    %c0 = arith.constant 0 : index
    %c0_0 = arith.constant 0 : index
    %c0_1 = arith.constant 0 : index
    %0 = vector.load %arg1[%c0, %c0_0, %c0_1] : memref<1x8x256xf32, #tpu.memory_space<vmem>>, vector<1x8x256xf32>
    %1 = vector.shape_cast %0 : vector<1x8x256xf32> to vector<8x256xf32>
    %c0_2 = arith.constant 0 : index
    %c0_3 = arith.constant 0 : index
    %2 = vector.load %arg2[%c0_2, %c0_3] : memref<256x768xf32, #tpu.memory_space<vmem>>, vector<256x768xf32>
    %cst = arith.constant dense<0.000000e+00> : vector<8x768xf32>
    %3 = tpu.matmul %1, %2, %cst {dimension_numbers = #tpu.dot_dimension_numbers<[1], [0], [0], [1], [0, 0, 1, 1], [], []>} : vector<8x256xf32>, vector<256x768xf32>, vector<8x768xf32> -> vector<8x768xf32>
    %4 = tpu.iota {dimensions = array<i32: 0>} : vector<8x8xi32>
    %5 = tpu.iota {dimensions = array<i32: 1>} : vector<8x8xi32>
    %6 = arith.cmpi sle, %5, %4 : vector<8x8xi32>
    %7 = vector.extract_strided_slice %3 {offsets = [0, 0], sizes = [8, 64], strides = [1, 1]} : vector<8x768xf32> to vector<8x64xf32>
    %8 = vector.extract_strided_slice %3 {offsets = [0, 256], sizes = [8, 64], strides = [1, 1]} : vector<8x768xf32> to vector<8x64xf32>
    %9 = vector.extract_strided_slice %3 {offsets = [0, 512], sizes = [8, 64], strides = [1, 1]} : vector<8x768xf32> to vector<8x64xf32>
    %cst_4 = arith.constant dense<0.000000e+00> : vector<8x8xf32>
    %10 = tpu.matmul %7, %8, %cst_4 {dimension_numbers = #tpu.dot_dimension_numbers<[1], [1], [0], [0], [0, 0, 1, 0], [], []>} : vector<8x64xf32>, vector<8x64xf32>, vector<8x8xf32> -> vector<8x8xf32>
    %cst_5 = arith.constant 6.250000e-02 : f32
    %11 = vector.broadcast %cst_5 : f32 to vector<8x8xf32>
    %12 = arith.mulf %10, %11 : vector<8x8xf32>
    %cst_6 = arith.constant -1.000000e+30 : f32
    %13 = vector.broadcast %cst_6 : f32 to vector<8x8xf32>
    %14 = arith.select %6, %12, %13 : vector<8x8xi1>, vector<8x8xf32>
    %cst_7 = arith.constant dense<0xFF800000> : vector<8xf32>
    %15 = vector.multi_reduction <maximumf>, %14, %cst_7 [1] : vector<8x8xf32> to vector<8xf32>
    %16 = vector.shape_cast %15 : vector<8xf32> to vector<8x1xf32>
    %17 = vector.broadcast %16 : vector<8x1xf32> to vector<8x8xf32>
    %18 = arith.subf %14, %17 : vector<8x8xf32>
    %19 = math.exp %18 : vector<8x8xf32>
    %cst_8 = arith.constant dense<0.000000e+00> : vector<8xf32>
    %20 = vector.multi_reduction <add>, %19, %cst_8 [1] : vector<8x8xf32> to vector<8xf32>
    %21 = vector.shape_cast %20 : vector<8xf32> to vector<8x1xf32>
    %22 = tpu.reciprocal %21 {approx = true} : vector<8x1xf32> -> vector<8x1xf32>
    %23 = vector.broadcast %22 : vector<8x1xf32> to vector<8x8xf32>
    %24 = arith.mulf %19, %23 : vector<8x8xf32>
    %cst_9 = arith.constant dense<0.000000e+00> : vector<8x64xf32>
    %25 = tpu.matmul %24, %9, %cst_9 {dimension_numbers = #tpu.dot_dimension_numbers<[1], [0], [0], [1], [0, 0, 1, 1], [], []>} : vector<8x8xf32>, vector<8x64xf32>, vector<8x64xf32> -> vector<8x64xf32>
    %26 = vector.extract_strided_slice %3 {offsets = [0, 64], sizes = [8, 64], strides = [1, 1]} : vector<8x768xf32> to vector<8x64xf32>
    %27 = vector.extract_strided_slice %3 {offsets = [0, 320], sizes = [8, 64], strides = [1, 1]} : vector<8x768xf32> to vector<8x64xf32>
    %28 = vector.extract_strided_slice %3 {offsets = [0, 576], sizes = [8, 64], strides = [1, 1]} : vector<8x768xf32> to vector<8x64xf32>
    %cst_10 = arith.constant dense<0.000000e+00> : vector<8x8xf32>
    %29 = tpu.matmul %26, %27, %cst_10 {dimension_numbers = #tpu.dot_dimension_numbers<[1], [1], [0], [0], [0, 0, 1, 0], [], []>} : vector<8x64xf32>, vector<8x64xf32>, vector<8x8xf32> -> vector<8x8xf32>
    %cst_11 = arith.constant 6.250000e-02 : f32
    %30 = vector.broadcast %cst_11 : f32 to vector<8x8xf32>
    %31 = arith.mulf %29, %30 : vector<8x8xf32>
    %cst_12 = arith.constant -1.000000e+30 : f32
    %32 = vector.broadcast %cst_12 : f32 to vector<8x8xf32>
    %33 = arith.select %6, %31, %32 : vector<8x8xi1>, vector<8x8xf32>
    %cst_13 = arith.constant dense<0xFF800000> : vector<8xf32>
    %34 = vector.multi_reduction <maximumf>, %33, %cst_13 [1] : vector<8x8xf32> to vector<8xf32>
    %35 = vector.shape_cast %34 : vector<8xf32> to vector<8x1xf32>
    %36 = vector.broadcast %35 : vector<8x1xf32> to vector<8x8xf32>
    %37 = arith.subf %33, %36 : vector<8x8xf32>
    %38 = math.exp %37 : vector<8x8xf32>
    %cst_14 = arith.constant dense<0.000000e+00> : vector<8xf32>
    %39 = vector.multi_reduction <add>, %38, %cst_14 [1] : vector<8x8xf32> to vector<8xf32>
    %40 = vector.shape_cast %39 : vector<8xf32> to vector<8x1xf32>
    %41 = tpu.reciprocal %40 {approx = true} : vector<8x1xf32> -> vector<8x1xf32>
    %42 = vector.broadcast %41 : vector<8x1xf32> to vector<8x8xf32>
    %43 = arith.mulf %38, %42 : vector<8x8xf32>
    %cst_15 = arith.constant dense<0.000000e+00> : vector<8x64xf32>
    %44 = tpu.matmul %43, %28, %cst_15 {dimension_numbers = #tpu.dot_dimension_numbers<[1], [0], [0], [1], [0, 0, 1, 1], [], []>} : vector<8x8xf32>, vector<8x64xf32>, vector<8x64xf32> -> vector<8x64xf32>
    %45 = vector.extract_strided_slice %3 {offsets = [0, 128], sizes = [8, 64], strides = [1, 1]} : vector<8x768xf32> to vector<8x64xf32>
    %46 = vector.extract_strided_slice %3 {offsets = [0, 384], sizes = [8, 64], strides = [1, 1]} : vector<8x768xf32> to vector<8x64xf32>
    %47 = vector.extract_strided_slice %3 {offsets = [0, 640], sizes = [8, 64], strides = [1, 1]} : vector<8x768xf32> to vector<8x64xf32>
    %cst_16 = arith.constant dense<0.000000e+00> : vector<8x8xf32>
    %48 = tpu.matmul %45, %46, %cst_16 {dimension_numbers = #tpu.dot_dimension_numbers<[1], [1], [0], [0], [0, 0, 1, 0], [], []>} : vector<8x64xf32>, vector<8x64xf32>, vector<8x8xf32> -> vector<8x8xf32>
    %cst_17 = arith.constant 6.250000e-02 : f32
    %49 = vector.broadcast %cst_17 : f32 to vector<8x8xf32>
    %50 = arith.mulf %48, %49 : vector<8x8xf32>
    %cst_18 = arith.constant -1.000000e+30 : f32
    %51 = vector.broadcast %cst_18 : f32 to vector<8x8xf32>
    %52 = arith.select %6, %50, %51 : vector<8x8xi1>, vector<8x8xf32>
    %cst_19 = arith.constant dense<0xFF800000> : vector<8xf32>
    %53 = vector.multi_reduction <maximumf>, %52, %cst_19 [1] : vector<8x8xf32> to vector<8xf32>
    %54 = vector.shape_cast %53 : vector<8xf32> to vector<8x1xf32>
    %55 = vector.broadcast %54 : vector<8x1xf32> to vector<8x8xf32>
    %56 = arith.subf %52, %55 : vector<8x8xf32>
    %57 = math.exp %56 : vector<8x8xf32>
    %cst_20 = arith.constant dense<0.000000e+00> : vector<8xf32>
    %58 = vector.multi_reduction <add>, %57, %cst_20 [1] : vector<8x8xf32> to vector<8xf32>
    %59 = vector.shape_cast %58 : vector<8xf32> to vector<8x1xf32>
    %60 = tpu.reciprocal %59 {approx = true} : vector<8x1xf32> -> vector<8x1xf32>
    %61 = vector.broadcast %60 : vector<8x1xf32> to vector<8x8xf32>
    %62 = arith.mulf %57, %61 : vector<8x8xf32>
    %cst_21 = arith.constant dense<0.000000e+00> : vector<8x64xf32>
    %63 = tpu.matmul %62, %47, %cst_21 {dimension_numbers = #tpu.dot_dimension_numbers<[1], [0], [0], [1], [0, 0, 1, 1], [], []>} : vector<8x8xf32>, vector<8x64xf32>, vector<8x64xf32> -> vector<8x64xf32>
    %64 = vector.extract_strided_slice %3 {offsets = [0, 192], sizes = [8, 64], strides = [1, 1]} : vector<8x768xf32> to vector<8x64xf32>
    %65 = vector.extract_strided_slice %3 {offsets = [0, 448], sizes = [8, 64], strides = [1, 1]} : vector<8x768xf32> to vector<8x64xf32>
    %66 = vector.extract_strided_slice %3 {offsets = [0, 704], sizes = [8, 64], strides = [1, 1]} : vector<8x768xf32> to vector<8x64xf32>
    %cst_22 = arith.constant dense<0.000000e+00> : vector<8x8xf32>
    %67 = tpu.matmul %64, %65, %cst_22 {dimension_numbers = #tpu.dot_dimension_numbers<[1], [1], [0], [0], [0, 0, 1, 0], [], []>} : vector<8x64xf32>, vector<8x64xf32>, vector<8x8xf32> -> vector<8x8xf32>
    %cst_23 = arith.constant 6.250000e-02 : f32
    %68 = vector.broadcast %cst_23 : f32 to vector<8x8xf32>
    %69 = arith.mulf %67, %68 : vector<8x8xf32>
    %cst_24 = arith.constant -1.000000e+30 : f32
    %70 = vector.broadcast %cst_24 : f32 to vector<8x8xf32>
    %71 = arith.select %6, %69, %70 : vector<8x8xi1>, vector<8x8xf32>
    %cst_25 = arith.constant dense<0xFF800000> : vector<8xf32>
    %72 = vector.multi_reduction <maximumf>, %71, %cst_25 [1] : vector<8x8xf32> to vector<8xf32>
    %73 = vector.shape_cast %72 : vector<8xf32> to vector<8x1xf32>
    %74 = vector.broadcast %73 : vector<8x1xf32> to vector<8x8xf32>
    %75 = arith.subf %71, %74 : vector<8x8xf32>
    %76 = math.exp %75 : vector<8x8xf32>
    %cst_26 = arith.constant dense<0.000000e+00> : vector<8xf32>
    %77 = vector.multi_reduction <add>, %76, %cst_26 [1] : vector<8x8xf32> to vector<8xf32>
    %78 = vector.shape_cast %77 : vector<8xf32> to vector<8x1xf32>
    %79 = tpu.reciprocal %78 {approx = true} : vector<8x1xf32> -> vector<8x1xf32>
    %80 = vector.broadcast %79 : vector<8x1xf32> to vector<8x8xf32>
    %81 = arith.mulf %76, %80 : vector<8x8xf32>
    %cst_27 = arith.constant dense<0.000000e+00> : vector<8x64xf32>
    %82 = tpu.matmul %81, %66, %cst_27 {dimension_numbers = #tpu.dot_dimension_numbers<[1], [0], [0], [1], [0, 0, 1, 1], [], []>} : vector<8x8xf32>, vector<8x64xf32>, vector<8x64xf32> -> vector<8x64xf32>
    %83 = tpu.concatenate %25, %44, %63, %82 in 1 : vector<8x64xf32>, vector<8x64xf32>, vector<8x64xf32>, vector<8x64xf32> -> vector<8x256xf32>
    %c0_28 = arith.constant 0 : index
    %c0_29 = arith.constant 0 : index
    %84 = vector.load %arg3[%c0_28, %c0_29] : memref<256x256xf32, #tpu.memory_space<vmem>>, vector<256x256xf32>
    %cst_30 = arith.constant dense<0.000000e+00> : vector<8x256xf32>
    %85 = tpu.matmul %83, %84, %cst_30 {dimension_numbers = #tpu.dot_dimension_numbers<[1], [0], [0], [1], [0, 0, 1, 1], [], []>} : vector<8x256xf32>, vector<256x256xf32>, vector<8x256xf32> -> vector<8x256xf32>
    %c0_31 = arith.constant 0 : index
    %c0_32 = arith.constant 0 : index
    %86 = vector.load %arg4[%c0_31, %c0_32] : memref<1x256xf32, #tpu.memory_space<vmem>>, vector<1x256xf32>
    %87 = vector.broadcast %86 : vector<1x256xf32> to vector<8x256xf32>
    %88 = arith.addf %85, %87 : vector<8x256xf32>
    %c0_33 = arith.constant 0 : index
    %c0_34 = arith.constant 0 : index
    %c0_35 = arith.constant 0 : index
    %89 = vector.load %arg5[%c0_33, %c0_34, %c0_35] : memref<1x8x256xf32, #tpu.memory_space<vmem>>, vector<1x8x256xf32>
    %90 = vector.shape_cast %89 : vector<1x8x256xf32> to vector<8x256xf32>
    %91 = vector.shape_cast %88 : vector<8x256xf32> to vector<1x8x256xf32>
    tpu.vector_store %arg5[%c0_33, %c0_34, %c0_35], %91 {strides = array<i32>} : memref<1x8x256xf32, #tpu.memory_space<vmem>>, vector<1x8x256xf32>,
    return
  }
  func.func @transform_0(%arg0: i32) -> (i32, i32, i32) {
    %c0_i32 = arith.constant 0 : i32
    %c0_i32_0 = arith.constant 0 : i32
    %c0_i32_1 = arith.constant 0 : i32
    return %arg0, %c0_i32, %c0_i32_0 : i32, i32, i32
  }
  func.func @transform_1(%arg0: i32) -> (i32, i32) {
    %c0_i32 = arith.constant 0 : i32
    %c0_i32_0 = arith.constant 0 : i32
    %c0_i32_1 = arith.constant 0 : i32
    return %c0_i32, %c0_i32_0 : i32, i32
  }
  func.func @transform_2(%arg0: i32) -> (i32, i32) {
    %c0_i32 = arith.constant 0 : i32
    %c0_i32_0 = arith.constant 0 : i32
    %c0_i32_1 = arith.constant 0 : i32
    return %c0_i32, %c0_i32_0 : i32, i32
  }
  func.func @transform_3(%arg0: i32) -> (i32, i32) {
    %c0_i32 = arith.constant 0 : i32
    %c0_i32_0 = arith.constant 0 : i32
    %c0_i32_1 = arith.constant 0 : i32
    return %c0_i32, %c0_i32_0 : i32, i32
  }
  func.func @transform_4(%arg0: i32) -> (i32, i32, i32) {
    %c0_i32 = arith.constant 0 : i32
    %c0_i32_0 = arith.constant 0 : i32
    %c0_i32_1 = arith.constant 0 : i32
    return %arg0, %c0_i32, %c0_i32_0 : i32, i32, i32
  }
}

</mosaic_0001>

<bundles_post_ra>
// kernel: tpu_custom_call.1
= control target key start
LH: loop header
LB: loop body
LE: loop exit
PB: predicated region body
PF: predicated region fallthrough
CT: control target
= control target key end

     0   :  { %9 = vsyncpa [#allocation3], 0  ;;  %s2550_s0 = inlined_call_operand.hbm [shape: f32[2,8,256], index: 0, kind: input, shape index: {}]   ;;  %s2551_s1 = inlined_call_operand.hbm [shape: f32[256,768], index: 1, kind: input, shape index: {}]   ;;  %s2552_s2 = inlined_call_operand.hbm [shape: f32[256,256], index: 2, kind: input, shape index: {}]   ;;  %s2553_s3 = inlined_call_operand.vmem [shape: f32[1,256], index: 3, kind: input, shape index: {}]   ;;  %s2554_s4 = inlined_call_operand.hbm [shape: f32[2,8,256], index: 4, kind: output, shape index: {}]  }
   0x1   :  { %11 = vsyncpa [#allocation3 + $0x1], 0 }
   0x2   :  { %12 = vsyncpa [#allocation6], 0 }
   0x3   :  { %13 = vsyncpa [#allocation4], 0 }
   0x4   :  { %15 = vsyncpa [#allocation4 + $0x1], 0  ;;  %s2213_s15 = smov 0   ;;  %s2215_s16 = smov 0  }
   0x5   :  { %s2217_s17 = smov 0   ;;  %s2219_s18 = smov 0  }
   0x6 LB: > { %s2234_s19 = sadd.s32 4294967295, %s2175_s18   ;;  %s1580_s20 = sadd.s32 4294967294, %s2175_s18   ;;  %s2175_s18 = sphi %s2219_s18, %s2574_s18   ;;  %s2171_s17 = sphi %s2217_s17, %s2573_s17   ;;  %s2167_s16 = sphi %s2215_s16, %s2572_s16   ;;  %s2163_s15 = sphi %s2213_s15, %s2571_s15  }
   0x7   : > { %p41_p0 = scmp.ne.s32.totalorder %s2167_s16, %s2163_s15  ;;  %p2555_p1 = scmp.eq.s32.totalorder %s2234_s19, 0 }
   0x8   : > { %p134_p3 = scmp.eq.s32.totalorder %s1580_s20, 1  ;;  %p1581_p5 = scmp.ge.s32.totalorder %s2175_s18, 1 }
   0x9   : > { %p2243_p4 = por %p2555_p1, %p41_p0  ;;  %p141_p7 = scmp.lt.s32.totalorder %s2175_s18, 3 }
   0xa   : > { %p2248_p6 = por %p134_p3, %p41_p0  ;;  %s2177_s24 = smov [#allocation5]  }
   0xb   : > { %s2558_s21 = scalar_select %p2243_p4, 1, 0 }
   0xc   : > { %s2559_s22 = scalar_select %p2248_p6, 1, 0 }
   0xd   : > { %p2253_p8 = pnand %p1581_p5, %p141_p7  ;;  %s153_s25 = sshll.u32 %s2177_s24, 4  ;;  %s2257_s25 = int_to_ptr.vmem [resolvable:$true] %s153_s25 }
   0xe   : > { %s2178_s27 = smov [#allocation7]   ;;  %s2019_s5 = scalar_lea.hbm %s2551_s1, 24576 }
   0xf   : > { %p1936_p9 = pneg %p2253_p8  ;;  %s166_s28 = sshll.u32 %s2178_s27, 4  ;;  %s2268_s28 = int_to_ptr.vmem [resolvable:$true] %s166_s28 }
  0x10   : > { %p2020_p12 = scmp.ne.s32.totalorder %s2551_s1, %s2019_s5  ;;  %p2026_p5 = scmp.lt.u32.totalorder %s2019_s5, %s2551_s1 }
  0x11   : > { %p2264_p11 = pnand %p1936_p9, %p2555_p1 }
  0x13   : > { %p2021_p13 = pneg %p2264_p11 }
  0x15   : > { %p2022_p0 = pnand %p2021_p13, %p2020_p12 }
  0x17   : > { %p2023_p3 = pneg %p2022_p0 }
  0x19   : > { %p2028_p7 = pnand %p2026_p5, %p2023_p3 }
  0x1b   : > { %2031 = shalt.err (!%p2028_p7)
}
  0x1c   : > { %s2032_s10 = scalar_lea.vmem %s2257_s25, 24576  ;;  %p2040_p2 = scmp.lt.s32.totalorder %s2257_s25, %s2257_s25 }
  0x1d   : > { %p2033_p9 = scmp.ne.s32.totalorder %s2257_s25, %s2032_s10  ;;  %p2041_p12 = scmp.lt.s32.totalorder %s2032_s10, %s2032_s10 }
  0x1f   : > { %p2035_p10 = pnand %p2033_p9, %p2021_p13  ;;  %p2042_p0 = por %p2041_p12, %p2040_p2 }
  0x21   : > { %p2036_p1 = pneg %p2035_p10 }
  0x23   : > { %p2043_p6 = pnand %p2042_p0, %p2036_p1 }
  0x25   : > { %2046 = shalt.err (!%p2043_p6)
}
  0x26   : > { %s2179_s11 = smov 768   ;;  %s2180_s12 = smov 48  }
  0x27   : > { %1939 = dma.hbm_to_vmem [thread:$0]  (!%p2264_p11), %s2551_s1, 24576, %s2257_s25, [#allocation6], %s2179_s11, %s2179_s11, %s2180_s12  }
  0x28   : > { %s2047_s27 = scalar_lea.hbm %s2552_s2, 8192 }
  0x29   : > { %p2048_p2 = scmp.ne.s32.totalorder %s2552_s2, %s2047_s27  ;;  %p2054_p10 = scmp.lt.u32.totalorder %s2047_s27, %s2552_s2 }
  0x2b   : > { %p2050_p1 = pnand %p2048_p2, %p2021_p13 }
  0x2d   : > { %p2051_p6 = pneg %p2050_p1 }
  0x2f   : > { %p2056_p3 = pnand %p2054_p10, %p2051_p6 }
  0x31   : > { %2059 = shalt.err (!%p2056_p3)
}
  0x32   : > { %s2060_s25 = scalar_lea.vmem %s2268_s28, 8192  ;;  %p2068_p12 = scmp.lt.s32.totalorder %s2268_s28, %s2268_s28 }
  0x33   : > { %p2061_p5 = scmp.ne.s32.totalorder %s2268_s28, %s2060_s25  ;;  %p2069_p0 = scmp.lt.s32.totalorder %s2060_s25, %s2060_s25 }
  0x35   : > { %p2063_p7 = pnand %p2061_p5, %p2021_p13  ;;  %p2070_p2 = por %p2069_p0, %p2068_p12 }
  0x37   : > { %p2064_p9 = pneg %p2063_p7 }
  0x39   : > { %p2071_p1 = pnand %p2070_p2, %p2064_p9 }
  0x3b   : > { %2074 = shalt.err (!%p2071_p1)
}
  0x3c   : > { %s2181_s7 = smov 256   ;;  %s2182_s8 = smov 16  }
  0x3d   : > { %1942 = dma.hbm_to_vmem [thread:$0]  (!%p2264_p11), %s2552_s2, 8192, %s2268_s28, [#allocation6], %s2181_s7, %s2181_s7, %s2182_s8  }
  0x3e   : > { %s2323_s11 = sadd.s32 1, %s2175_s18   ;;  %s28_s13 = sadd.s32 1, %s2171_s17 }
  0x3f   : > { %s25_s12 = ssub.s32 %s2175_s18, %s2323_s11  ;;  %p35_p6 = scmp.ne.s32.totalorder %s2171_s17, %s2167_s16 }
  0x40   : > { %p26_p13 = scmp.eq.s32.totalorder %s25_s12, 0  ;;  %p36_p10 = scmp.eq.s32.totalorder %s2175_s18, 0 }
  0x41   : > { %p2562_p5 = scmp.eq.s32.totalorder %s2234_s19, 1  ;;  %p1953_p9 = scmp.lt.s32.totalorder %s2175_s18, 2 }
  0x42   : > { %s2332_s14 = scalar_select %p26_p13, %s2171_s17, %s28_s13  }
  0x43   : > { %p37_p3 = por %p36_p10, %p35_p6  ;;  %p2336_p7 = por %p2562_p5, %p35_p6 }
  0x44   : > { %s183_s26 = sand.u32 1, %s2171_s17   ;;  %s1610_s28 = sshll.u32 %s2175_s18, 8 }
  0x45   : > { %s2563_s20 = scalar_select %p2336_p7, 1, 0 }
  0x46   : > { %s1585_s24 = sshll.u32 %s183_s26, 4  ;;  %s2346_s30 = scalar_lea.hbm %s2550_s0, %s1610_s28 }
  0x47   : > { %s187_s5 = scalar_lea.vmem [#allocation2], %s1585_s24  ;;  %p2350_p11 = pnand %p1953_p9, %p37_p3 }
  0x48   : > { %s195_s6 = sshll.u32 %s187_s5, 4  ;;  %s184_s7 = scalar_lea.sflag [#allocation3], %s183_s26  ;;  %s2348_s6 = int_to_ptr.vmem [resolvable:$true] %s195_s6 }
  0x49   : > { %s2075_s8 = scalar_lea.hbm %s2346_s30, 256  ;;  %p2077_p0 = pneg %p2350_p11 }
  0x4a   : > { %p2076_p12 = scmp.ne.s32.totalorder %s2346_s30, %s2075_s8  ;;  %s2080_s12 = scalar_lea.hbm %s2550_s0, 512 }
  0x4b   : > { %p2081_p13 = scmp.lt.u32.totalorder %s2346_s30, %s2550_s0  ;;  %p2082_p6 = scmp.lt.u32.totalorder %s2080_s12, %s2075_s8 }
  0x4c   : > { %p2078_p2 = pnand %p2077_p0, %p2076_p12  ;;  %p2084_p3 = scmp.lt.u32.totalorder %s2075_s8, %s2346_s30 }
  0x4d   : > { %p2083_p10 = por %p2082_p6, %p2081_p13 }
  0x4e   : > { %p2079_p1 = pneg %p2078_p2 }
  0x4f   : > { %p2085_p5 = por %p2084_p3, %p2083_p10 }
  0x51   : > { %p2086_p9 = pnand %p2085_p5, %p2079_p1 }
  0x53   : > { %2089 = shalt.err (!%p2086_p9)
}
  0x54   : > { %s2090_s26 = scalar_lea.vmem %s2348_s6, 256  ;;  %s2183_s28 = smov [#allocation2]  }
  0x55   : > { %p2091_p12 = scmp.ne.s32.totalorder %s2348_s6, %s2090_s26  ;;  %s2095_s27 = sshll.u32 %s2183_s28, 4  ;;  %s2096_s27 = int_to_ptr.vmem [resolvable:$false] %s2095_s27 }
  0x56   : > { %s2097_s29 = scalar_lea.vmem %s2096_s27, 512  ;;  %p2098_p4 = scmp.lt.s32.totalorder %s2348_s6, %s2096_s27 }
  0x57   : > { %p2093_p2 = pnand %p2091_p12, %p2077_p0  ;;  %p2099_p13 = scmp.lt.s32.totalorder %s2097_s29, %s2090_s26 }
  0x59   : > { %p2094_p7 = pneg %p2093_p2  ;;  %p2100_p6 = por %p2099_p13, %p2098_p4 }
  0x5b   : > { %p2101_p10 = pnand %p2100_p6, %p2094_p7 }
  0x5d   : > { %2104 = shalt.err (!%p2101_p10)
}
  0x5e   : > { %1946 = dma.hbm_to_vmem [thread:$0]  (!%p2350_p11), %s2346_s30, 256, %s2348_s6, %s184_s7  }
  0x5f   : > { %204 = sbr.rel (%p2253_p8) target bundleno = 2021 (0x7e5), region = 36  ;;  %s2382_s5 = sand.u32 (!%p2253_p8), 1, %s2167_s16  }
  0x60   : > { %s1589_s8 = sshll.u32 (!%p2253_p8), %s2382_s5, 4  ;;  %s207_s9 = scalar_lea.sflag (!%p2253_p8), [#allocation3], %s2382_s5 }
  0x61   : > { %s2388_s10 = scalar_lea.vmem (!%p2253_p8), [#allocation2], %s1589_s8  ;;  %p2565_p4 = scmp.ne.s32.totalorder (!%p2253_p8), %s2558_s21, 0 }
  0x66   : > { %2150 = dma.done.wait (%p2565_p4), %s207_s9, 256  }
  0x67   : > { %2152 = vsyncadd (%p2565_p4), %s207_s9, 4294967040  ;;  %p2566_p7 = scmp.eq.s32.totalorder %s2234_s19, 0 }
  0x69   : > { %2154 = dma.done.wait (%p2566_p7), [#allocation6], 32768   ;;  %p2567_p8 = pmov %p2566_p7 }
  0x6a   : > { %v248_v0 = vld [vmem:[#allocation5 + $0x18] sm:$0xff]  ;;  %v254_v1 = vld [vmem:[#allocation5 + $0x48] sm:$0xff]  ;;  %v247_v2 = vld [vmem:[#allocation5 + $0x10] sm:$0xff]  ;;  %vm2185_vm0 = vmmov 0   ;;  %vm655_vm1 = vcmask 523264   ;;  %s2186_s21 = smov 64  }
  0x6b   : > { %2156 = vsyncadd (%p2567_p8), [#allocation6], 4294934528  ;;  %v1732_v3 = vpack.c.bf16 %v254_v1, %v248_v0  ;;  %v253_v4 = vld [vmem:[#allocation5 + $0x40] sm:$0xff]  ;;  %v246_v5 = vld [vmem:[#allocation5 + $0x8] sm:$0xff]  ;;  %vm734_vm3 = vcmask 64512   ;;  %s1611_s6 = sshll.u32 %s2234_s19, 8 }
  0x6c   : > { %v252_v6 = vld [vmem:[#allocation5 + $0x38] sm:$0xff]  ;;  %v1734_v7 = vpack.c.bf16 %v253_v4, %v247_v2  ;;  %v245_v9 = vld [vmem:[#allocation5] sm:$0xff]  ;;  %v251_v10 = vld [vmem:[#allocation5 + $0x30] sm:$0xff]  ;;  %s242_s25 = scalar_lea.vmem [#allocation8], %s1589_s8  ;;  %s2506_s24 = scalar_lea.hbm %s2554_s4, %s1611_s6 }
  0x6d   : > { %v1668_v8 = vpack.c.bf16 %v252_v6, %v246_v5  ;;  %v260_v11 = vld [vmem:[#allocation5 + $0x78] sm:$0xff]  ;;  %1733 = vmatprep.subr.bf16.mxu1 %v1732_v3  ;;  %v1670_v12 = vpack.c.bf16 %v251_v10, %v245_v9  ;;  %v266_v13 = vld [vmem:[#allocation5 + $0xa8] sm:$0xff]  ;;  %v259_v14 = vld [vmem:[#allocation5 + $0x70] sm:$0xff]  ;;  %s1491_s7 = sshll.u32 %s242_s25, 4  ;;  %s1477_s19 = scalar_lea.sflag [#allocation4], %s2382_s5  ;;  %s2508_s7 = int_to_ptr.vmem [resolvable:$true] %s1491_s7 }
  0x6e   : > { %v265_v15 = vld [vmem:[#allocation5 + $0xa0] sm:$0xff]  ;;  %1735 = vmatpush1.bf16.msra.mxu1 %v1734_v7  ;;  %v1736_v16 = vpack.c.bf16 %v266_v13, %v260_v11  ;;  %v258_v18 = vld [vmem:[#allocation5 + $0x68] sm:$0xff]  ;;  %v264_v19 = vld [vmem:[#allocation5 + $0x98] sm:$0xff]  ;;  %s2105_s26 = scalar_lea.vmem %s2508_s7, 256  ;;  %p2568_p0 = scmp.ne.s32.totalorder %s2563_s20, 0 }
  0x6f   : > { %1669 = vmatprep.subr.bf16.mxu0 %v1668_v8  ;;  %v1738_v17 = vpack.c.bf16 %v265_v15, %v259_v14  ;;  %v257_v20 = vld [vmem:[#allocation5 + $0x60] sm:$0xff]  ;;  %v1672_v21 = vpack.c.bf16 %v264_v19, %v258_v18  ;;  %v263_v22 = vld [vmem:[#allocation5 + $0x90] sm:$0xff]  ;;  %v272_v23 = vld [vmem:[#allocation5 + $0xd8] sm:$0xff]  ;;  %p2106_p11 = scmp.ne.s32.totalorder %s2508_s7, %s2105_s26  ;;  %s2187_s28 = smov [#allocation8]  }
  0x70   : > { %1671 = vmatpush1.bf16.msra.mxu0 %v1670_v12  ;;  %v278_v24 = vld [vmem:[#allocation5 + $0x108] sm:$0xff]  ;;  %1737 = vmatprep.subr.bf16.mxu1 %v1736_v16  ;;  %v1674_v25 = vpack.c.bf16 %v263_v22, %v257_v20  ;;  %v271_v27 = vld [vmem:[#allocation5 + $0xd0] sm:$0xff]  ;;  %v277_v28 = vld [vmem:[#allocation5 + $0x100] sm:$0xff]  ;;  %s2109_s27 = sshll.u32 %s2187_s28, 4  ;;  %s2110_s27 = int_to_ptr.vmem [resolvable:$false] %s2109_s27 }
  0x71   : > { %v1740_v26 = vpack.c.bf16 %v278_v24, %v272_v23  ;;  %v270_v29 = vld [vmem:[#allocation5 + $0xc8] sm:$0xff]  ;;  %1673 = vmatprep.subr.bf16.mxu0 %v1672_v21  ;;  %v276_v30 = vld [vmem:[#allocation5 + $0xf8] sm:$0xff]  ;;  %v269_v31 = vld [vmem:[#allocation5 + $0xc0] sm:$0xff]  ;;  %v1742_v33 = vpack.c.bf16 %v277_v28, %v271_v27  ;;  %p2107_p1 = pnand %p2106_p11, %p2568_p0  ;;  %s2111_s29 = scalar_lea.vmem %s2110_s27, 512 }
  0x72   : > { %v275_v32 = vld [vmem:[#allocation5 + $0xf0] sm:$0xff]  ;;  %1739 = vmatpush1.bf16.msra.mxu1 %v1738_v17  ;;  %v1676_v34 = vpack.c.bf16 %v276_v30, %v270_v29  ;;  %v284_v35 = vld [vmem:[#allocation5 + $0x138] sm:$0xff]  ;;  %v290_v36 = vld [vmem:[#allocation5 + $0x168] sm:$0xff]  ;;  %p2112_p5 = scmp.lt.s32.totalorder %s2508_s7, %s2110_s27  ;;  %p2113_p9 = scmp.lt.s32.totalorder %s2111_s29, %s2105_s26 }
  0x73   : > { %v283_v37 = vld [vmem:[#allocation5 + $0x130] sm:$0xff]  ;;  %1741 = vmatprep.subr.bf16.mxu1 %v1740_v26  ;;  %v1678_v38 = vpack.c.bf16 %v275_v32, %v269_v31  ;;  %v1744_v39 = vpack.c.bf16 %v290_v36, %v284_v35  ;;  %v289_v40 = vld [vmem:[#allocation5 + $0x160] sm:$0xff]  ;;  %v282_v41 = vld [vmem:[#allocation5 + $0x128] sm:$0xff]  ;;  %p2108_p3 = pneg %p2107_p1 }
  0x74   : > { %1675 = vmatpush1.bf16.msra.mxu0 %v1674_v25  ;;  %v288_v42 = vld [vmem:[#allocation5 + $0x158] sm:$0xff]  ;;  %v281_v44 = vld [vmem:[#allocation5 + $0x120] sm:$0xff]  ;;  %v287_v45 = vld [vmem:[#allocation5 + $0x150] sm:$0xff]  ;;  %v1746_v48 = vpack.c.bf16 %v289_v40, %v283_v37  ;;  %p2114_p12 = por %p2113_p9, %p2112_p5 }
  0x75   : > { %1677 = vmatprep.subr.bf16.mxu0 %v1676_v34  ;;  %v1680_v43 = vpack.c.bf16 %v288_v42, %v282_v41  ;;  %v296_v46 = vld [vmem:[#allocation5 + $0x198] sm:$0xff]  ;;  %v302_v47 = vld [vmem:[#allocation5 + $0x1c8] sm:$0xff]  ;;  %v1682_v51 = vpack.c.bf16 %v287_v45, %v281_v44  ;;  %v295_v53 = vld [vmem:[#allocation5 + $0x190] sm:$0xff] }
  0x76   : > { %1743 = vmatpush1.bf16.msra.mxu1 %v1742_v33  ;;  %v294_v49 = vld [vmem:[#allocation5 + $0x188] sm:$0xff]  ;;  %v300_v50 = vld [vmem:[#allocation5 + $0x1b8] sm:$0xff]  ;;  %v1748_v52 = vpack.c.bf16 %v302_v47, %v296_v46  ;;  %v301_v54 = vld [vmem:[#allocation5 + $0x1c0] sm:$0xff]  ;;  %p2115_p2 = pnand %p2114_p12, %p2108_p3 }
  0x77   : > { %1745 = vmatprep.subr.bf16.mxu1 %v1744_v39  ;;  %v293_v55 = vld [vmem:[#allocation5 + $0x180] sm:$0xff]  ;;  %v1684_v56 = vpack.c.bf16 %v300_v50, %v294_v49  ;;  %v299_v57 = vld [vmem:[#allocation5 + $0x1b0] sm:$0xff]  ;;  %v308_v58 = vld [vmem:[#allocation5 + $0x1f8] sm:$0xff]  ;;  %v1750_v62 = vpack.c.bf16 %v301_v54, %v295_v53 }
  0x78   : > { %1679 = vmatpush1.bf16.msra.mxu0 %v1678_v38  ;;  %v314_v59 = vld [vmem:[#allocation5 + $0x228] sm:$0xff]  ;;  %v312_v61 = vld [vmem:[#allocation5 + $0x218] sm:$0xff]  ;;  %v1686_v63 = vpack.c.bf16 %v299_v57, %v293_v55  ;;  %v307_v1 = vld [vmem:[#allocation5 + $0x1f0] sm:$0xff] }
  0x79   : > { %1681 = vmatprep.subr.bf16.mxu0 %v1680_v43  ;;  %v306_v60 = vld [vmem:[#allocation5 + $0x1e8] sm:$0xff]  ;;  %v1752_v0 = vpack.c.bf16 %v314_v59, %v308_v58  ;;  %v313_v2 = vld [vmem:[#allocation5 + $0x220] sm:$0xff]  ;;  %v311_v5 = vld [vmem:[#allocation5 + $0x210] sm:$0xff] }
  0x7a   : > { %1747 = vmatpush1.bf16.msra.mxu1 %v1746_v48  ;;  %v305_v3 = vld [vmem:[#allocation5 + $0x1e0] sm:$0xff]  ;;  %v1688_v4 = vpack.c.bf16 %v312_v61, %v306_v60  ;;  %v320_v6 = vld [vmem:[#allocation5 + $0x258] sm:$0xff]  ;;  %v326_v7 = vld [vmem:[#allocation5 + $0x288] sm:$0xff]  ;;  %v1754_v10 = vpack.c.bf16 %v313_v2, %v307_v1 }
  0x7b   : > { %1749 = vmatprep.subr.bf16.mxu1 %v1748_v52  ;;  %v318_v8 = vld [vmem:[#allocation5 + $0x248] sm:$0xff]  ;;  %v324_v9 = vld [vmem:[#allocation5 + $0x278] sm:$0xff]  ;;  %v1690_v11 = vpack.c.bf16 %v311_v5, %v305_v3  ;;  %v1756_v12 = vpack.c.bf16 %v326_v7, %v320_v6  ;;  %v319_v13 = vld [vmem:[#allocation5 + $0x250] sm:$0xff] }
  0x7c   : > { %1683 = vmatpush1.bf16.msra.mxu0 %v1682_v51  ;;  %v325_v14 = vld [vmem:[#allocation5 + $0x280] sm:$0xff]  ;;  %v1692_v16 = vpack.c.bf16 %v324_v9, %v318_v8  ;;  %v323_v17 = vld [vmem:[#allocation5 + $0x270] sm:$0xff]  ;;  %v332_v18 = vld [vmem:[#allocation5 + $0x2b8] sm:$0xff] }
  0x7d   : > { %1685 = vmatprep.subr.bf16.mxu0 %v1684_v56  ;;  %v317_v15 = vld [vmem:[#allocation5 + $0x240] sm:$0xff]  ;;  %v338_v19 = vld [vmem:[#allocation5 + $0x2e8] sm:$0xff]  ;;  %v336_v21 = vld [vmem:[#allocation5 + $0x2d8] sm:$0xff]  ;;  %v1758_v22 = vpack.c.bf16 %v325_v14, %v319_v13 }
  0x7e   : > { %1751 = vmatpush1.bf16.msra.mxu1 %v1750_v62  ;;  %v330_v20 = vld [vmem:[#allocation5 + $0x2a8] sm:$0xff]  ;;  %v1694_v23 = vpack.c.bf16 %v323_v17, %v317_v15  ;;  %v1760_v24 = vpack.c.bf16 %v338_v19, %v332_v18  ;;  %v331_v25 = vld [vmem:[#allocation5 + $0x2b0] sm:$0xff]  ;;  %v337_v26 = vld [vmem:[#allocation5 + $0x2e0] sm:$0xff] }
  0x7f   : > { %1753 = vmatprep.subr.bf16.mxu1 %v1752_v0  ;;  %v329_v27 = vld [vmem:[#allocation5 + $0x2a0] sm:$0xff]  ;;  %v1696_v28 = vpack.c.bf16 %v336_v21, %v330_v20  ;;  %v335_v29 = vld [vmem:[#allocation5 + $0x2d0] sm:$0xff]  ;;  %v344_v30 = vld [vmem:[#allocation5 + $0x318] sm:$0xff]  ;;  %v1762_v34 = vpack.c.bf16 %v337_v26, %v331_v25 }
  0x80   : > { %1687 = vmatpush1.bf16.msra.mxu0 %v1686_v63  ;;  %v350_v31 = vld [vmem:[#allocation5 + $0x348] sm:$0xff]  ;;  %v348_v33 = vld [vmem:[#allocation5 + $0x338] sm:$0xff]  ;;  %v1698_v35 = vpack.c.bf16 %v335_v29, %v329_v27  ;;  %v343_v37 = vld [vmem:[#allocation5 + $0x310] sm:$0xff] }
  0x81   : > { %1689 = vmatprep.subr.bf16.mxu0 %v1688_v4  ;;  %v342_v32 = vld [vmem:[#allocation5 + $0x308] sm:$0xff]  ;;  %v1764_v36 = vpack.c.bf16 %v350_v31, %v344_v30  ;;  %v349_v38 = vld [vmem:[#allocation5 + $0x340] sm:$0xff]  ;;  %v347_v41 = vld [vmem:[#allocation5 + $0x330] sm:$0xff] }
  0x82   : > { %1755 = vmatpush1.bf16.msra.mxu1 %v1754_v10  ;;  %v341_v39 = vld [vmem:[#allocation5 + $0x300] sm:$0xff]  ;;  %v1700_v40 = vpack.c.bf16 %v348_v33, %v342_v32  ;;  %v356_v42 = vld [vmem:[#allocation5 + $0x378] sm:$0xff]  ;;  %v362_v43 = vld [vmem:[#allocation5 + $0x3a8] sm:$0xff]  ;;  %v1766_v46 = vpack.c.bf16 %v349_v38, %v343_v37 }
  0x83   : > { %1757 = vmatprep.subr.bf16.mxu1 %v1756_v12  ;;  %v354_v44 = vld [vmem:[#allocation5 + $0x368] sm:$0xff]  ;;  %v360_v45 = vld [vmem:[#allocation5 + $0x398] sm:$0xff]  ;;  %v1702_v47 = vpack.c.bf16 %v347_v41, %v341_v39  ;;  %v1768_v48 = vpack.c.bf16 %v362_v43, %v356_v42  ;;  %v355_v49 = vld [vmem:[#allocation5 + $0x370] sm:$0xff] }
  0x84   : > { %1691 = vmatpush1.bf16.msra.mxu0 %v1690_v11  ;;  %v361_v50 = vld [vmem:[#allocation5 + $0x3a0] sm:$0xff]  ;;  %v1704_v52 = vpack.c.bf16 %v360_v45, %v354_v44  ;;  %v359_v53 = vld [vmem:[#allocation5 + $0x390] sm:$0xff]  ;;  %v368_v54 = vld [vmem:[#allocation5 + $0x3d8] sm:$0xff] }
  0x85   : > { %1693 = vmatprep.subr.bf16.mxu0 %v1692_v16  ;;  %v353_v51 = vld [vmem:[#allocation5 + $0x360] sm:$0xff]  ;;  %v374_v55 = vld [vmem:[#allocation5 + $0x408] sm:$0xff]  ;;  %v372_v57 = vld [vmem:[#allocation5 + $0x3f8] sm:$0xff]  ;;  %v1770_v58 = vpack.c.bf16 %v361_v50, %v355_v49 }
  0x86   : > { %1759 = vmatpush1.bf16.msra.mxu1 %v1758_v22  ;;  %v366_v56 = vld [vmem:[#allocation5 + $0x3c8] sm:$0xff]  ;;  %v1706_v59 = vpack.c.bf16 %v359_v53, %v353_v51  ;;  %v1772_v60 = vpack.c.bf16 %v374_v55, %v368_v54  ;;  %v367_v61 = vld [vmem:[#allocation5 + $0x3d0] sm:$0xff]  ;;  %v373_v62 = vld [vmem:[#allocation5 + $0x400] sm:$0xff] }
  0x87   : > { %1761 = vmatprep.subr.bf16.mxu1 %v1760_v24  ;;  %v365_v63 = vld [vmem:[#allocation5 + $0x3c0] sm:$0xff]  ;;  %v1708_v0 = vpack.c.bf16 %v372_v57, %v366_v56  ;;  %v371_v1 = vld [vmem:[#allocation5 + $0x3f0] sm:$0xff]  ;;  %v380_v2 = vld [vmem:[#allocation5 + $0x438] sm:$0xff]  ;;  %v1774_v6 = vpack.c.bf16 %v373_v62, %v367_v61 }
  0x88   : > { %1695 = vmatpush1.bf16.msra.mxu0 %v1694_v23  ;;  %v386_v3 = vld [vmem:[#allocation5 + $0x468] sm:$0xff]  ;;  %v384_v5 = vld [vmem:[#allocation5 + $0x458] sm:$0xff]  ;;  %v379_v7 = vld [vmem:[#allocation5 + $0x430] sm:$0xff]  ;;  %v1710_v8 = vpack.c.bf16 %v371_v1, %v365_v63 }
  0x89   : > { %1697 = vmatprep.subr.bf16.mxu0 %v1696_v28  ;;  %v378_v4 = vld [vmem:[#allocation5 + $0x428] sm:$0xff]  ;;  %v1776_v9 = vpack.c.bf16 %v386_v3, %v380_v2  ;;  %v385_v10 = vld [vmem:[#allocation5 + $0x460] sm:$0xff]  ;;  %v383_v12 = vld [vmem:[#allocation5 + $0x450] sm:$0xff] }
  0x8a   : > { %1763 = vmatpush1.bf16.msra.mxu1 %v1762_v34  ;;  %v377_v11 = vld [vmem:[#allocation5 + $0x420] sm:$0xff]  ;;  %v1712_v13 = vpack.c.bf16 %v384_v5, %v378_v4  ;;  %v392_v14 = vld [vmem:[#allocation5 + $0x498] sm:$0xff]  ;;  %v398_v15 = vld [vmem:[#allocation5 + $0x4c8] sm:$0xff]  ;;  %v1778_v19 = vpack.c.bf16 %v385_v10, %v379_v7 }
  0x8b   : > { %1765 = vmatprep.subr.bf16.mxu1 %v1764_v36  ;;  %v2399_v16 = vld [vmem:[%s2388_s10 + $0x8] sm:$0xff]  ;;  %v1714_v20 = vpack.c.bf16 %v383_v12, %v377_v11  ;;  %v1780_v21 = vpack.c.bf16 %v398_v15, %v392_v14  ;;  %v391_v22 = vld [vmem:[#allocation5 + $0x490] sm:$0xff]  ;;  %v397_v23 = vld [vmem:[#allocation5 + $0x4c0] sm:$0xff] }
  0x8c   : > { %1699 = vmatpush1.bf16.msra.mxu0 %v1698_v35  ;;  %v390_v17 = vld [vmem:[#allocation5 + $0x488] sm:$0xff]  ;;  %v396_v18 = vld [vmem:[#allocation5 + $0x4b8] sm:$0xff]  ;;  %572 = vmatprep.mubr.f32.mxu1 %v2399_v16  ;;  %v389_v24 = vld [vmem:[#allocation5 + $0x480] sm:$0xff]  ;;  %v1782_v31 = vpack.c.bf16 %v397_v23, %v391_v22 }
  0x8d   : > { %1701 = vmatprep.subr.bf16.mxu0 %v1700_v40  ;;  %501 = vmatprep.mubr.f32.mxu0 %v2399_v16  ;;  %v1716_v25 = vpack.c.bf16 %v396_v18, %v390_v17  ;;  %v395_v26 = vld [vmem:[#allocation5 + $0x4b0] sm:$0xff]  ;;  %v404_v27 = vld [vmem:[#allocation5 + $0x4f8] sm:$0xff]  ;;  %v410_v28 = vld [vmem:[#allocation5 + $0x528] sm:$0xff] }
  0x8e   : > { %1767 = vmatpush1.bf16.msra.mxu1 %v1766_v46  ;;  %v402_v29 = vld [vmem:[#allocation5 + $0x4e8] sm:$0xff]  ;;  %v408_v30 = vld [vmem:[#allocation5 + $0x518] sm:$0xff]  ;;  %v1718_v32 = vpack.c.bf16 %v395_v26, %v389_v24  ;;  %v1784_v33 = vpack.c.bf16 %v410_v28, %v404_v27  ;;  %v403_v34 = vld [vmem:[#allocation5 + $0x4f0] sm:$0xff] }
  0x8f   : > { %1769 = vmatprep.subr.bf16.mxu1 %v1768_v48  ;;  %v409_v35 = vld [vmem:[#allocation5 + $0x520] sm:$0xff]  ;;  %v1720_v37 = vpack.c.bf16 %v408_v30, %v402_v29  ;;  %v407_v38 = vld [vmem:[#allocation5 + $0x510] sm:$0xff]  ;;  %v416_v39 = vld [vmem:[#allocation5 + $0x558] sm:$0xff] }
  0x90   : > { %1703 = vmatpush1.bf16.msra.mxu0 %v1702_v47  ;;  %v401_v36 = vld [vmem:[#allocation5 + $0x4e0] sm:$0xff]  ;;  %v422_v40 = vld [vmem:[#allocation5 + $0x588] sm:$0xff]  ;;  %v420_v42 = vld [vmem:[#allocation5 + $0x578] sm:$0xff]  ;;  %v1786_v43 = vpack.c.bf16 %v409_v35, %v403_v34 }
  0x91   : > { %1705 = vmatprep.subr.bf16.mxu0 %v1704_v52  ;;  %v414_v41 = vld [vmem:[#allocation5 + $0x548] sm:$0xff]  ;;  %v1722_v44 = vpack.c.bf16 %v407_v38, %v401_v36  ;;  %v1788_v45 = vpack.c.bf16 %v422_v40, %v416_v39  ;;  %v415_v46 = vld [vmem:[#allocation5 + $0x550] sm:$0xff]  ;;  %v421_v47 = vld [vmem:[#allocation5 + $0x580] sm:$0xff] }
  0x92   : > { %1771 = vmatpush1.bf16.msra.mxu1 %v1770_v58  ;;  %v413_v48 = vld [vmem:[#allocation5 + $0x540] sm:$0xff]  ;;  %v1724_v49 = vpack.c.bf16 %v420_v42, %v414_v41  ;;  %v419_v50 = vld [vmem:[#allocation5 + $0x570] sm:$0xff]  ;;  %v428_v51 = vld [vmem:[#allocation5 + $0x5b8] sm:$0xff]  ;;  %v1790_v55 = vpack.c.bf16 %v421_v47, %v415_v46 }
  0x93   : > { %1773 = vmatprep.subr.bf16.mxu1 %v1772_v60  ;;  %v434_v52 = vld [vmem:[#allocation5 + $0x5e8] sm:$0xff]  ;;  %v432_v54 = vld [vmem:[#allocation5 + $0x5d8] sm:$0xff]  ;;  %v1726_v56 = vpack.c.bf16 %v419_v50, %v413_v48  ;;  %v427_v58 = vld [vmem:[#allocation5 + $0x5b0] sm:$0xff] }
  0x94   : > { %1707 = vmatpush1.bf16.msra.mxu0 %v1706_v59  ;;  %v426_v53 = vld [vmem:[#allocation5 + $0x5a8] sm:$0xff]  ;;  %v1792_v57 = vpack.c.bf16 %v434_v52, %v428_v51  ;;  %v433_v59 = vld [vmem:[#allocation5 + $0x5e0] sm:$0xff]  ;;  %v431_v62 = vld [vmem:[#allocation5 + $0x5d0] sm:$0xff] }
  0x95   : > { %1709 = vmatprep.subr.bf16.mxu0 %v1708_v0  ;;  %v1728_v60 = vpack.c.bf16 %v432_v54, %v426_v53  ;;  %v425_v61 = vld [vmem:[#allocation5 + $0x5a0] sm:$0xff]  ;;  %v250_v63 = vld [vmem:[#allocation5 + $0x28] sm:$0xff]  ;;  %v256_v0 = vld [vmem:[#allocation5 + $0x58] sm:$0xff]  ;;  %v1794_v1 = vpack.c.bf16 %v433_v59, %v427_v58 }
  0x96   : > { %1775 = vmatpush1.bf16.msra.mxu1 %v1774_v6  ;;  %v1730_v2 = vpack.c.bf16 %v431_v62, %v425_v61  ;;  %v1796_v3 = vpack.c.bf16 %v256_v0, %v250_v63  ;;  %v249_v4 = vld [vmem:[#allocation5 + $0x20] sm:$0xff]  ;;  %v255_v5 = vld [vmem:[#allocation5 + $0x50] sm:$0xff]  ;;  %v262_v6 = vld [vmem:[#allocation5 + $0x88] sm:$0xff] }
  0x97   : > { %1777 = vmatprep.subr.bf16.mxu1 %v1776_v9  ;;  %v268_v7 = vld [vmem:[#allocation5 + $0xb8] sm:$0xff]  ;;  %v1798_v9 = vpack.c.bf16 %v255_v5, %v249_v4  ;;  %v261_v11 = vld [vmem:[#allocation5 + $0x80] sm:$0xff]  ;;  %v267_v12 = vld [vmem:[#allocation5 + $0xb0] sm:$0xff] }
  0x98   : > { %1711 = vmatpush1.bf16.msra.mxu0 %v1710_v8  ;;  %v2404_v8 = vld [vmem:[%s2388_s10] sm:$0xff]  ;;  %v1800_v10 = vpack.c.bf16 %v268_v7, %v262_v6  ;;  %v280_v14 = vld [vmem:[#allocation5 + $0x118] sm:$0xff]  ;;  %v1802_v15 = vpack.c.bf16 %v267_v12, %v261_v11  ;;  %v298_v26 = vld [vmem:[#allocation5 + $0x1a8] sm:$0xff] }
  0x99   : > { %1713 = vmatprep.subr.bf16.mxu0 %v1712_v13  ;;  %v274_v13 = vld [vmem:[#allocation5 + $0xe8] sm:$0xff]  ;;  %v273_v18 = vld [vmem:[#allocation5 + $0xe0] sm:$0xff]  ;;  %v304_v27 = vld [vmem:[#allocation5 + $0x1d8] sm:$0xff] }
  0x9a   : > { %1779 = vmatpush1.bf16.msra.mxu1 %v1778_v19  ;;  %v1804_v17 = vpack.c.bf16 %v280_v14, %v274_v13  ;;  %v279_v19 = vld [vmem:[#allocation5 + $0x110] sm:$0xff]  ;;  %v285_v24 = vld [vmem:[#allocation5 + $0x140] sm:$0xff]  ;;  %v1812_v29 = vpack.c.bf16 %v304_v27, %v298_v26  ;;  %v328_v38 = vld [vmem:[#allocation5 + $0x298] sm:$0xff] }
  0x9b   : > { %1781 = vmatprep.subr.bf16.mxu1 %v1780_v21  ;;  %v292_v21 = vld [vmem:[#allocation5 + $0x178] sm:$0xff]  ;;  %v1806_v22 = vpack.c.bf16 %v279_v19, %v273_v18  ;;  %v297_v30 = vld [vmem:[#allocation5 + $0x1a0] sm:$0xff]  ;;  %v315_v36 = vld [vmem:[#allocation5 + $0x230] sm:$0xff] }
  0x9c   : > { %1715 = vmatpush1.bf16.msra.mxu0 %v1714_v20  ;;  %v286_v20 = vld [vmem:[#allocation5 + $0x148] sm:$0xff]  ;;  %v309_v35 = vld [vmem:[#allocation5 + $0x200] sm:$0xff]  ;;  %v327_v42 = vld [vmem:[#allocation5 + $0x290] sm:$0xff] }
  0x9d   : > { %1717 = vmatprep.subr.bf16.mxu0 %v1716_v25  ;;  %v1808_v23 = vpack.c.bf16 %v292_v21, %v286_v20  ;;  %v291_v25 = vld [vmem:[#allocation5 + $0x170] sm:$0xff]  ;;  %v1818_v39 = vpack.c.bf16 %v315_v36, %v309_v35  ;;  %v321_v41 = vld [vmem:[#allocation5 + $0x260] sm:$0xff]  ;;  %v352_v50 = vld [vmem:[#allocation5 + $0x358] sm:$0xff]  ;;  %v2184_v35 = vmov 0.0  }
  0x9e   : > { %1783 = vmatpush1.bf16.msra.mxu1 %v1782_v31  ;;  %v1810_v28 = vpack.c.bf16 %v291_v25, %v285_v24  ;;  %v310_v31 = vld [vmem:[#allocation5 + $0x208] sm:$0xff]  ;;  %v333_v47 = vld [vmem:[#allocation5 + $0x2c0] sm:$0xff]  ;;  %v339_v48 = vld [vmem:[#allocation5 + $0x2f0] sm:$0xff] }
  0x9f   : > { %1785 = vmatprep.subr.bf16.mxu1 %v1784_v33  ;;  %v1826_v51 = vpack.c.bf16 %v339_v48, %v333_v47  ;;  %v345_v53 = vld [vmem:[#allocation5 + $0x320] sm:$0xff]  ;;  %v351_v54 = vld [vmem:[#allocation5 + $0x350] sm:$0xff]  ;;  %v370_v61 = vld [vmem:[#allocation5 + $0x3e8] sm:$0xff] }
  0xa0   : > { %1719 = vmatpush1.bf16.msra.mxu0 %v1718_v32  ;;  %v316_v32 = vld [vmem:[#allocation5 + $0x238] sm:$0xff]  ;;  %v357_v59 = vld [vmem:[#allocation5 + $0x380] sm:$0xff] }
  0xa1   : > { %1721 = vmatprep.subr.bf16.mxu0 %v1720_v37  ;;  %v1816_v34 = vpack.c.bf16 %v316_v32, %v310_v31  ;;  %v322_v37 = vld [vmem:[#allocation5 + $0x268] sm:$0xff]  ;;  %v376_v62 = vld [vmem:[#allocation5 + $0x418] sm:$0xff]  ;;  %v381_v7 = vld [vmem:[#allocation5 + $0x440] sm:$0xff] }
  0xa2   : > { %1787 = vmatpush1.bf16.msra.mxu1 %v1786_v43  ;;  %v1820_v40 = vpack.c.bf16 %v328_v38, %v322_v37  ;;  %v334_v43 = vld [vmem:[#allocation5 + $0x2c8] sm:$0xff]  ;;  %v1836_v0 = vpack.c.bf16 %v376_v62, %v370_v61  ;;  %v388_v4 = vld [vmem:[#allocation5 + $0x478] sm:$0xff]  ;;  %v393_v14 = vld [vmem:[#allocation5 + $0x4a0] sm:$0xff] }
  0xa3   : > { %1789 = vmatprep.subr.bf16.mxu1 %v1788_v45  ;;  %v1822_v45 = vpack.c.bf16 %v327_v42, %v321_v41  ;;  %v400_v11 = vld [vmem:[#allocation5 + $0x4d8] sm:$0xff]  ;;  %v405_v21 = vld [vmem:[#allocation5 + $0x500] sm:$0xff]  ;;  %v650_v41 = vlaneseq }
  0xa4   : > { %1723 = vmatpush1.bf16.msra.mxu0 %v1722_v44  ;;  %v340_v44 = vld [vmem:[#allocation5 + $0x2f8] sm:$0xff]  ;;  %v417_v27 = vld [vmem:[#allocation5 + $0x560] sm:$0xff] }
  0xa5   : > { %1725 = vmatprep.subr.bf16.mxu0 %v1724_v49  ;;  %v1824_v46 = vpack.c.bf16 %v340_v44, %v334_v43  ;;  %v346_v49 = vld [vmem:[#allocation5 + $0x328] sm:$0xff]  ;;  %v412_v18 = vld [vmem:[#allocation5 + $0x538] sm:$0xff]  ;;  %v429_v32 = vld [vmem:[#allocation5 + $0x5c0] sm:$0xff]  ;;  %v2436_v42 = vshrl.u32 %v650_v41, 7  ;;  %v2438_v43 = vand.u32 127, %v650_v41 }
  0xa6   : > { %1791 = vmatpush1.bf16.msra.mxu1 %v1790_v55  ;;  %v1828_v52 = vpack.c.bf16 %v352_v50, %v346_v49  ;;  %v358_v55 = vld [vmem:[#allocation5 + $0x388] sm:$0xff]  ;;  %v424_v24 = vld [vmem:[#allocation5 + $0x598] sm:$0xff] }
  0xa7   : > { %1793 = vmatprep.subr.bf16.mxu1 %v1792_v57  ;;  %v1830_v57 = vpack.c.bf16 %v351_v54, %v345_v53  ;;  %vm654_vm2 = vcmp.le.s32.totalorder %v2438_v43, %v2436_v42 }
  0xa8   : > { %1727 = vmatpush1.bf16.msra.mxu0 %v1726_v56  ;;  %v364_v56 = vld [vmem:[#allocation5 + $0x3b8] sm:$0xff] }
  0xa9   : > { %1729 = vmatprep.subr.bf16.mxu0 %v1728_v60  ;;  %v1832_v58 = vpack.c.bf16 %v364_v56, %v358_v55  ;;  %v363_v60 = vld [vmem:[#allocation5 + $0x3b0] sm:$0xff] }
  0xaa   : > { %1795 = vmatpush1.bf16.msra.mxu1 %v1794_v1  ;;  %v1834_v63 = vpack.c.bf16 %v363_v60, %v357_v59  ;;  %v369_v1 = vld [vmem:[#allocation5 + $0x3e0] sm:$0xff] }
  0xab   : > { %1648 = vmatprep.subr.mxu1 %v2184_v35 }
  0xac   : > { %1731 = vmatpush1.bf16.msra.mxu0 %v1730_v2  ;;  %v375_v2 = vld [vmem:[#allocation5 + $0x410] sm:$0xff] }
  0xad   : > { %1797 = vmatprep.subr.bf16.mxu0 %v1796_v3  ;;  %573 = vmatmul.mubr.f32.vlgmr.msra.gmra.mrb[0].mxu1 %v2404_v8  ;;  %v382_v3 = vld [vmem:[#allocation5 + $0x448] sm:$0xff]  ;;  %v1838_v5 = vpack.c.bf16 %v375_v2, %v369_v1 }
  0xae   : > { %v1840_v6 = vpack.c.bf16 %v388_v4, %v382_v3  ;;  %1650 = vmatprep.mubr.msk.f32.mxu1 %vm2185_vm0, %v2184_v35 }
  0xaf   : > { %502 = vmatmul.mubr.f32.vlgmr.msra.gmra.mrb[0].mxu0 %v2404_v8 }
  0xb0   : > { %1799 = vmatpush1.bf16.msra.mxu0 %v1798_v9  ;;  %643 = vmatprep.mubr.f32.mxu0 %v2399_v16  ;;  %v303_v16 = vld [vmem:[#allocation5 + $0x1d0] sm:$0xff] }
  0xb1   : > { %1801 = vmatprep.subr.bf16.mxu0 %v1800_v10  ;;  %v1814_v33 = vpack.c.bf16 %v303_v16, %v297_v30  ;;  %v387_v9 = vld [vmem:[#allocation5 + $0x470] sm:$0xff]  ;;  %v394_v10 = vld [vmem:[#allocation5 + $0x4a8] sm:$0xff]  ;;  %v436_v30 = vld [vmem:[#allocation5 + $0x5f8] sm:$0xff] }
  0xb2   : > { %v1842_v12 = vpack.c.bf16 %v387_v9, %v381_v7  ;;  %v1844_v13 = vpack.c.bf16 %v400_v11, %v394_v10 }
  0xb4   : > { %1803 = vmatpush1.bf16.msra.mxu0 %v1802_v15  ;;  %v399_v15 = vld [vmem:[#allocation5 + $0x4d0] sm:$0xff] }
  0xb5   : > { %1805 = vmatprep.subr.bf16.mxu0 %v1804_v17  ;;  %v406_v17 = vld [vmem:[#allocation5 + $0x508] sm:$0xff]  ;;  %v1846_v19 = vpack.c.bf16 %v399_v15, %v393_v14 }
  0xb6   : > { %v1848_v20 = vpack.c.bf16 %v412_v18, %v406_v17 }
  0xb8   : > { %1807 = vmatpush1.bf16.msra.mxu0 %v1806_v22  ;;  %v411_v22 = vld [vmem:[#allocation5 + $0x530] sm:$0xff] }
  0xb9   : > { %1809 = vmatprep.subr.bf16.mxu0 %v1808_v23  ;;  %v418_v23 = vld [vmem:[#allocation5 + $0x568] sm:$0xff]  ;;  %v1850_v25 = vpack.c.bf16 %v411_v22, %v405_v21 }
  0xba   : > { %v1852_v26 = vpack.c.bf16 %v424_v24, %v418_v23 }
  0xbc   : > { %1811 = vmatpush1.bf16.msra.mxu0 %v1810_v28  ;;  %v423_v28 = vld [vmem:[#allocation5 + $0x590] sm:$0xff] }
  0xbd   : > { %1813 = vmatprep.subr.bf16.mxu0 %v1812_v29  ;;  %v430_v29 = vld [vmem:[#allocation5 + $0x5c8] sm:$0xff]  ;;  %v1854_v16 = vpack.c.bf16 %v423_v28, %v417_v27 }
  0xbe   : > { %v1856_v31 = vpack.c.bf16 %v436_v30, %v430_v29 }
  0xc0   : > { %1815 = vmatpush1.bf16.msra.mxu0 %v1814_v33  ;;  %v435_v33 = vld [vmem:[#allocation5 + $0x5f0] sm:$0xff] }
  0xc1   : > { %1817 = vmatprep.subr.bf16.mxu0 %v1816_v34  ;;  %v1858_v34 = vpack.c.bf16 %v435_v33, %v429_v32 }
  0xc4   : > { %1819 = vmatpush1.bf16.msra.mxu0 %v1818_v39 }
  0xc5   : > { %1821 = vmatprep.subr.bf16.mxu0 %v1820_v40 }
  0xc8   : > { %1823 = vmatpush1.bf16.msra.mxu0 %v1822_v45 }
  0xc9   : > { %1825 = vmatprep.subr.bf16.mxu0 %v1824_v46 }
  0xcc   : > { %1827 = vmatpush1.bf16.msra.mxu0 %v1826_v51 }
  0xcd   : > { %1829 = vmatprep.subr.bf16.mxu0 %v1828_v52 }
  0xd0   : > { %1831 = vmatpush1.bf16.msra.mxu0 %v1830_v57 }
  0xd1   : > { %1833 = vmatprep.subr.bf16.mxu0 %v1832_v58 }
  0xd4   : > { %1835 = vmatpush1.bf16.msra.mxu0 %v1834_v63 }
  0xd5   : > { %1837 = vmatprep.subr.bf16.mxu0 %v1836_v0 }
  0xd8   : > { %1839 = vmatpush1.bf16.msra.mxu0 %v1838_v5 }
  0xd9   : > { %1841 = vmatprep.subr.bf16.mxu0 %v1840_v6 }
  0xdc   : > { %1843 = vmatpush1.bf16.msra.mxu0 %v1842_v12 }
  0xdd   : > { %1845 = vmatprep.subr.bf16.mxu0 %v1844_v13 }
  0xe0   : > { %1847 = vmatpush1.bf16.msra.mxu0 %v1846_v19 }
  0xe1   : > { %1849 = vmatprep.subr.bf16.mxu0 %v1848_v20 }
  0xe4   : > { %1851 = vmatpush1.bf16.msra.mxu0 %v1850_v25 }
  0xe5   : > { %1853 = vmatprep.subr.bf16.mxu0 %v1852_v26 }
  0xe8   : > { %1855 = vmatpush1.bf16.msra.mxu0 %v1854_v16 }
  0xe9   : > { %1857 = vmatprep.subr.bf16.mxu0 %v1856_v31 }
  0xec   : > { %1859 = vmatpush1.bf16.msra.mxu0 %v1858_v34 }
  0xed   : > { %1628 = vmatprep.subr.mxu0 %v2184_v35 }
  0xef   : > { %644 = vmatmul.mubr.f32.vlgmr.msra.gmra.mrb[2].mxu0 %v2404_v8 }
  0xf0   : > { %1630 = vmatprep.mubr.msk.f32.mxu0 %vm2185_vm0, %v2184_v35 }
 0x180   : > { %v574_v36 = vpop.f32.mrb[0].mxu1 }
 0x181   : > { %821 = vrot.lane.b32.xlu1 %v574_v36, %s2186_s21  ;;  %v576_v37 = vpop.f32.mrb[1].mxu1  ;;  %1629 = vmatpush3.xpose.msk.msra.mxu0 %vm655_vm1, %v574_v36 }
 0x182   : > { %v503_v8 = vpop.f32.mrb[0].mxu0  ;;  %1649 = vmatpush3.xpose.msk.msra.mxu1 %vm655_vm1, %v576_v37  ;;  %1633 = vmatprep.subr.mxu0 %v2184_v35 }
 0x183   : > { %v505_v38 = vpop.f32.mrb[1].mxu0  ;;  %1653 = vmatprep.subr.mxu1 %v2184_v35 }
 0x184   : > { %1631 = vmatmul.mubr.msk.f32.vlgmr.msra.gmra.mrb[4].mxu0 %vm655_vm1, %v503_v8 }
 0x185   : > { %1149 = vrot.lane.b32.xlu1 %v505_v38, %s2186_s21  ;;  %1651 = vmatmul.mubr.msk.f32.vlgmr.msra.gmra.mrb[2].mxu1 %vm655_vm1, %v505_v38 }
 0x186   : > { %1635 = vmatprep.mubr.msk.f32.mxu0 %vm2185_vm0, %v2184_v35  ;;  %1655 = vmatprep.mubr.msk.f32.mxu1 %vm2185_vm0, %v2184_v35 }
 0x1c2   : > { %v2428_v39 = vpop.f32.mrb[2].mxu0 }
 0x1c3   : > { %v2430_v40 = vpop.f32.mrb[3].mxu0  ;;  %1634 = vmatpush3.msra.mxu0 %v2428_v39 }
 0x1c4   : > { %1654 = vmatpush3.msra.mxu1 %v2430_v40  ;;  %1638 = vmatprep.subr.mxu0 %v2184_v35 }
 0x1c5   : > { %1658 = vmatprep.subr.mxu1 %v2184_v35 }
 0x1f3   : > { %v822_v0 = vpop.permute.xlu1 %821 }
 0x1f7   : > { %v1150_v1 = vpop.permute.xlu1 %1149 }
 0x257   : > { %v728_v44 = vpop.f32.mrb[4].mxu0 }
 0x258   : > { %v1632_v45 = vpop.f32.mrb[5].mxu0  ;;  %v1059_v46 = vpop.f32.mrb[2].mxu1  ;;  %v732_v47 = vmul.f32 0.0625, %v728_v44  ;;  %v1328_v44 = vld [vmem:[#allocation7 + $0x8] sm:$0xff] }
 0x259   : > { %v1063_v48 = vmul.f32 0.0625, %v1059_v46  ;;  %v1652_v49 = vpop.f32.mrb[3].mxu1  ;;  %v1330_v45 = vld [vmem:[#allocation7 + $0x18] sm:$0xff]  ;;  %v1327_v46 = vld [vmem:[#allocation7] sm:$0xff] }
 0x25a   : > { %v733_v52 = vsel %vm654_vm2, %v732_v47, -1e+30  ;;  %v1860_v47 = vpack.c.bf16 %v1330_v45, %v1328_v44  ;;  %v1334_v49 = vld [vmem:[#allocation7 + $0x38] sm:$0xff] }
 0x25b   : > { %v1064_v50 = vsel %vm654_vm2, %v1063_v48, -1e+30  ;;  %v735_v53 = vsel %vm734_vm3, %v733_v52, -inf  ;;  %v1329_v48 = vld [vmem:[#allocation7 + $0x10] sm:$0xff] }
 0x25c   : > { %v1065_v51 = vsel %vm734_vm3, %v1064_v50, -inf }
 0x25d   : > { %1066 = vmax.xlane.f32.xlu0 %v1065_v51 }
 0x261   : > { %736 = vmax.xlane.f32.xlu0 %v735_v53  ;;  %v1333_v53 = vld [vmem:[#allocation7 + $0x30] sm:$0xff] }
 0x277   : > { %1151 = vrot.lane.b32.xlu0 %v576_v37, %s2186_s21 }
 0x2ea   : > { %v1067_v54 = vpop.xlane.xlu0 %1066 }
 0x2eb   : > { %v1068_v55 = vsub.f32 %v1064_v50, %v1067_v54  ;;  %v1862_v50 = vpack.c.bf16 %v1329_v48, %v1327_v46  ;;  %v1336_v54 = vld [vmem:[#allocation7 + $0x48] sm:$0xff]  ;;  %v1367_v46 = vld [vmem:[#allocation7 + $0x140] sm:$0xff] }
 0x2ec   : > { %v1372_v48 = vld [vmem:[#allocation7 + $0x168] sm:$0xff] }
 0x2ed   : > { %v1069_v58 = vmul.f32 1.442695, %v1068_v55  ;;  %v1338_v55 = vld [vmem:[#allocation7 + $0x58] sm:$0xff] }
 0x2ee   : > { %v737_v56 = vpop.xlane.xlu0 %736 }
 0x2ef   : > { %v738_v57 = vsub.f32 %v733_v52, %v737_v56  ;;  %v1331_v52 = vld [vmem:[#allocation7 + $0x20] sm:$0xff] }
 0x2f0   : > { %v1866_v56 = vpack.c.bf16 %v1333_v53, %v1331_v52  ;;  %v1373_v52 = vld [vmem:[#allocation7 + $0x170] sm:$0xff]  ;;  %v1376_v53 = vld [vmem:[#allocation7 + $0x188] sm:$0xff] }
 0x2f1   : > { %v739_v59 = vmul.f32 1.442695, %v738_v57  ;;  %v1868_v57 = vpack.c.bf16 %v1338_v55, %v1336_v54  ;;  %v1378_v54 = vld [vmem:[#allocation7 + $0x198] sm:$0xff] }
 0x2f2   : > { %v1152_v10 = vpop.permute.xlu0 %1151 }
 0x2f3   : > { %2003 = vpow2.f32 %v739_v59  ;;  %v1337_v59 = vld [vmem:[#allocation7 + $0x50] sm:$0xff] }
 0x2f4   : > { %2005 = vpow2.f32 %v1069_v58  ;;  %v1335_v58 = vld [vmem:[#allocation7 + $0x40] sm:$0xff] }
 0x2fd   : > { %v2004_v60 = vpop.eup %2003 }
 0x2fe   : > { %v741_v61 = vsel %vm734_vm3, %v2004_v60, 0.0  ;;  %v2006_v62 = vpop.eup %2005 }
 0x2ff   : > { %742 = vadd.xlane.f32.xlu1 %v741_v61  ;;  %v1071_v63 = vsel %vm734_vm3, %v2006_v62, 0.0  ;;  %v1342_v61 = vld [vmem:[#allocation7 + $0x78] sm:$0xff] }
 0x303   : > { %1072 = vadd.xlane.f32.xlu1 %v1071_v63 }
 0x314   : > { %819 = vrot.lane.b32.xlu1 %v503_v8, %s2186_s21 }
 0x38c   : > { %v743_v2 = vpop.xlane.xlu1 %742 }
 0x38d   : > { %2007 = vrcp.f32 %v743_v2  ;;  %v1344_v2 = vld [vmem:[#allocation7 + $0x88] sm:$0xff] }
 0x390   : > { %v1073_v3 = vpop.xlane.xlu1 %1072 }
 0x391   : > { %2009 = vrcp.f32 %v1073_v3  ;;  %v1346_v3 = vld [vmem:[#allocation7 + $0x98] sm:$0xff] }
 0x394   : > { %v820_v9 = vpop.permute.xlu1 %819 }
 0x397   : > { %v2008_v4 = vpop.eup %2007 }
 0x398   : > { %v745_v5 = vmul.f32 %v2008_v4, %v2004_v60  ;;  %v1340_v60 = vld [vmem:[#allocation7 + $0x68] sm:$0xff] }
 0x399   : > { %v1872_v63 = vpack.c.bf16 %v1342_v61, %v1340_v60  ;;  %v1382_v60 = vld [vmem:[#allocation7 + $0x1b8] sm:$0xff] }
 0x39a   : > { %1636 = vmatmul.mubr.msk.f32.vlgmr.msra.gmra.mrb[6].mxu0 %vm734_vm3, %v745_v5  ;;  %v1876_v5 = vpack.c.bf16 %v1346_v3, %v1344_v2  ;;  %v1386_v2 = vld [vmem:[#allocation7 + $0x1d8] sm:$0xff] }
 0x39b   : > { %v2010_v6 = vpop.eup %2009  ;;  %1639 = vmatpush3.xpose.msk.msra.mxu0 %vm655_vm1, %v822_v0  ;;  %1640 = vmatprep.mubr.msk.f32.mxu0 %vm2185_vm0, %v2184_v35  ;;  %v1339_v0 = vld [vmem:[#allocation7 + $0x60] sm:$0xff] }
 0x39c   : > { %v1075_v7 = vmul.f32 %v2010_v6, %v2006_v62  ;;  %1643 = vmatprep.subr.mxu0 %v2184_v35  ;;  %v1870_v62 = vpack.c.bf16 %v1337_v59, %v1335_v58  ;;  %v1343_v6 = vld [vmem:[#allocation7 + $0x80] sm:$0xff]  ;;  %v1377_v58 = vld [vmem:[#allocation7 + $0x190] sm:$0xff]  ;;  %v1380_v59 = vld [vmem:[#allocation7 + $0x1a8] sm:$0xff] }
 0x39e   : > { %1641 = vmatmul.mubr.msk.f32.vlgmr.msra.gmra.mrb[8].mxu0 %vm655_vm1, %v820_v9  ;;  %1656 = vmatmul.mubr.msk.f32.vlgmr.msra.gmra.mrb[4].mxu1 %vm734_vm3, %v1075_v7  ;;  %v1345_v7 = vld [vmem:[#allocation7 + $0x90] sm:$0xff]  ;;  %v1348_v9 = vld [vmem:[#allocation7 + $0xa8] sm:$0xff] }
 0x39f   : > { %1659 = vmatpush3.xpose.msk.msra.mxu1 %vm655_vm1, %v1152_v10  ;;  %1660 = vmatprep.mubr.msk.f32.mxu1 %vm2185_vm0, %v2184_v35  ;;  %v1350_v10 = vld [vmem:[#allocation7 + $0xb8] sm:$0xff] }
 0x3a0   : > { %1663 = vmatprep.subr.mxu1 %v2184_v35  ;;  %1645 = vmatprep.mubr.msk.f32.mxu0 %vm2185_vm0, %v2184_v35 }
 0x3a2   : > { %1661 = vmatmul.mubr.msk.f32.vlgmr.msra.gmra.mrb[6].mxu1 %vm655_vm1, %v1150_v1  ;;  %v1341_v1 = vld [vmem:[#allocation7 + $0x70] sm:$0xff] }
 0x3a3   : > { %1665 = vmatprep.mubr.msk.f32.mxu1 %vm2185_vm0, %v2184_v35  ;;  %v1874_v4 = vpack.c.bf16 %v1341_v1, %v1339_v0  ;;  %v1381_v0 = vld [vmem:[#allocation7 + $0x1b0] sm:$0xff]  ;;  %v1384_v1 = vld [vmem:[#allocation7 + $0x1c8] sm:$0xff] }
 0x46d   : > { %v2470_v11 = vpop.f32.mrb[6].mxu0 }
 0x46e   : > { %v1637_v12 = vpop.f32.mrb[7].mxu0 }
 0x46f   : > { %v1878_v12 = vpack.c.bf16 %v1345_v7, %v1343_v6  ;;  %v1385_v6 = vld [vmem:[#allocation7 + $0x1d0] sm:$0xff] }
 0x471   : > { %v893_v13 = vpop.f32.mrb[8].mxu0  ;;  %v2472_v14 = vpop.f32.mrb[4].mxu1 }
 0x472   : > { %v897_v15 = vmul.f32 0.0625, %v893_v13  ;;  %v1642_v17 = vpop.f32.mrb[9].mxu0  ;;  %v1657_v18 = vpop.f32.mrb[5].mxu1  ;;  %v1880_v13 = vpack.c.bf16 %v1350_v10, %v1348_v9  ;;  %v1388_v9 = vld [vmem:[#allocation7 + $0x1e8] sm:$0xff]  ;;  %v1390_v10 = vld [vmem:[#allocation7 + $0x1f8] sm:$0xff] }
 0x473   : > { %v1349_v17 = vld [vmem:[#allocation7 + $0xb0] sm:$0xff]  ;;  %v1352_v18 = vld [vmem:[#allocation7 + $0xc8] sm:$0xff] }
 0x474   : > { %v898_v19 = vsel %vm654_vm2, %v897_v15, -1e+30  ;;  %v1347_v15 = vld [vmem:[#allocation7 + $0xa0] sm:$0xff] }
 0x475   : > { %v1223_v20 = vpop.f32.mrb[6].mxu1  ;;  %v899_v21 = vsel %vm734_vm3, %v898_v19, -inf }
 0x476   : > { %v1227_v22 = vmul.f32 0.0625, %v1223_v20  ;;  %v1662_v23 = vpop.f32.mrb[7].mxu1  ;;  %900 = vmax.xlane.f32.xlu1 %v899_v21  ;;  %v1882_v20 = vpack.c.bf16 %v1349_v17, %v1347_v15  ;;  %v1389_v15 = vld [vmem:[#allocation7 + $0x1f0] sm:$0xff] }
 0x477   : > { %v1353_v23 = vld [vmem:[#allocation7 + $0xd0] sm:$0xff] }
 0x478   : > { %v1228_v24 = vsel %vm654_vm2, %v1227_v22, -1e+30  ;;  %v1351_v22 = vld [vmem:[#allocation7 + $0xc0] sm:$0xff] }
 0x479   : > { %v1229_v25 = vsel %vm734_vm3, %v1228_v24, -inf }
 0x47a   : > { %1230 = vmax.xlane.f32.xlu0 %v1229_v25  ;;  %v1358_v25 = vld [vmem:[#allocation7 + $0xf8] sm:$0xff] }
 0x487   : > { %911 = vrot.lane.b32.xlu1 %v2428_v39, %s2186_s21 }
 0x503   : > { %v901_v26 = vpop.xlane.xlu1 %900 }
 0x504   : > { %v902_v27 = vsub.f32 %v898_v19, %v901_v26  ;;  %v1354_v19 = vld [vmem:[#allocation7 + $0xd8] sm:$0xff]  ;;  %v1886_v26 = vpack.c.bf16 %v1353_v23, %v1351_v22 }
 0x505   : > { %v1884_v21 = vpack.c.bf16 %v1354_v19, %v1352_v18 }
 0x506   : > { %v903_v28 = vmul.f32 1.442695, %v902_v27 }
 0x507   : > { %v1231_v29 = vpop.xlane.xlu0 %1230  ;;  %v912_v30 = vpop.permute.xlu1 %911 }
 0x508   : > { %2011 = vpow2.f32 %v903_v28  ;;  %v1232_v16 = vsub.f32 %v1228_v24, %v1231_v29  ;;  %1644 = vmatpush3.msra.mxu0 %v912_v30  ;;  %v1356_v24 = vld [vmem:[#allocation7 + $0xe8] sm:$0xff]  ;;  %v1355_v28 = vld [vmem:[#allocation7 + $0xe0] sm:$0xff]  ;;  %v1357_v29 = vld [vmem:[#allocation7 + $0xf0] sm:$0xff] }
 0x509   : > { %v1888_v27 = vpack.c.bf16 %v1358_v25, %v1356_v24  ;;  %v1360_v30 = vld [vmem:[#allocation7 + $0x108] sm:$0xff] }
 0x50a   : > { %v1233_v31 = vmul.f32 1.442695, %v1232_v16  ;;  %v1362_v16 = vld [vmem:[#allocation7 + $0x118] sm:$0xff] }
 0x50c   : > { %2013 = vpow2.f32 %v1233_v31  ;;  %v1890_v31 = vpack.c.bf16 %v1357_v29, %v1355_v28  ;;  %v1395_v28 = vsub.s32 0, %v2436_v42  ;;  %v1391_v29 = vld [vmem:[%s2553_s3] sm:$0x3] }
 0x512   : > { %v2012_v32 = vpop.eup %2011 }
 0x513   : > { %v905_v33 = vsel %vm734_vm3, %v2012_v32, 0.0 }
 0x514   : > { %906 = vadd.xlane.f32.xlu0 %v905_v33  ;;  %v1359_v33 = vld [vmem:[#allocation7 + $0x100] sm:$0xff] }
 0x516   : > { %v2014_v34 = vpop.eup %2013 }
 0x517   : > { %v1235_v35 = vsel %vm734_vm3, %v2014_v34, 0.0 }
 0x518   : > { %1236 = vadd.xlane.f32.xlu0 %v1235_v35  ;;  %v1364_v35 = vld [vmem:[#allocation7 + $0x128] sm:$0xff] }
 0x52e   : > { %1241 = vrot.lane.b32.xlu0 %v2430_v40, %s2186_s21  ;;  %v1332_v40 = vld [vmem:[#allocation7 + $0x28] sm:$0xff] }
 0x52f   : > { %v1864_v51 = vpack.c.bf16 %v1334_v49, %v1332_v40  ;;  %v1374_v40 = vld [vmem:[#allocation7 + $0x178] sm:$0xff] }
 0x5a1   : > { %v907_v36 = vpop.xlane.xlu0 %906 }
 0x5a2   : > { %2015 = vrcp.f32 %v907_v36  ;;  %v1366_v36 = vld [vmem:[#allocation7 + $0x138] sm:$0xff] }
 0x5a5   : > { %v1237_v37 = vpop.xlane.xlu0 %1236 }
 0x5a6   : > { %2017 = vrcp.f32 %v1237_v37 }
 0x5a9   : > { %v1242_v8 = vpop.permute.xlu0 %1241 }
 0x5aa   : > { %1664 = vmatpush3.msra.mxu1 %v1242_v8  ;;  %v1896_v8 = vpack.c.bf16 %v1366_v36, %v1364_v35 }
 0x5ab   : > { %1861 = vmatprep.subr.bf16.mxu1 %v1860_v47  ;;  %v1369_v47 = vld [vmem:[#allocation7 + $0x150] sm:$0xff] }
 0x5ac   : > { %v2016_v38 = vpop.eup %2015  ;;  %v1902_v49 = vpack.c.bf16 %v1369_v47, %v1367_v46 }
 0x5ad   : > { %v909_v39 = vmul.f32 %v2016_v38, %v2012_v32  ;;  %v1892_v32 = vpack.c.bf16 %v1362_v16, %v1360_v30  ;;  %v1363_v38 = vld [vmem:[#allocation7 + $0x120] sm:$0xff]  ;;  %v1399_v30 = vsub.s32 1, %v2436_v42  ;;  %v1396_v16 = vrot.slane %v1391_v29, %v1395_v28 }
 0x5af   : > { %1646 = vmatmul.mubr.msk.f32.vlgmr.msra.gmra.mrb[10].mxu0 %vm734_vm3, %v909_v39  ;;  %v1365_v39 = vld [vmem:[#allocation7 + $0x130] sm:$0xff] }
 0x5b0   : > { %v2018_v41 = vpop.eup %2017  ;;  %v1898_v44 = vpack.c.bf16 %v1365_v39, %v1363_v38 }
 0x5b1   : > { %v1239_v43 = vmul.f32 %v2018_v41, %v2014_v34  ;;  %v1361_v34 = vld [vmem:[#allocation7 + $0x110] sm:$0xff]  ;;  %v1368_v41 = vld [vmem:[#allocation7 + $0x148] sm:$0xff] }
 0x5b2   : > { %v1894_v37 = vpack.c.bf16 %v1361_v34, %v1359_v33 }
 0x5b3   : > { %1666 = vmatmul.mubr.msk.f32.vlgmr.msra.gmra.mrb[8].mxu1 %vm734_vm3, %v1239_v43  ;;  %v1370_v43 = vld [vmem:[#allocation7 + $0x158] sm:$0xff] }
 0x5b4   : > { %1863 = vmatpush1.bf16.msra.mxu1 %v1862_v50  ;;  %v1900_v45 = vpack.c.bf16 %v1370_v43, %v1368_v41  ;;  %v1904_v50 = vpack.c.bf16 %v1374_v40, %v1372_v48 }
 0x5b5   : > { %1865 = vmatprep.subr.bf16.mxu1 %v1864_v51  ;;  %v1371_v51 = vld [vmem:[#allocation7 + $0x160] sm:$0xff] }
 0x5b6   : > { %v1906_v55 = vpack.c.bf16 %v1373_v52, %v1371_v51 }
 0x5b8   : > { %1867 = vmatpush1.bf16.msra.mxu1 %v1866_v56  ;;  %v1908_v56 = vpack.c.bf16 %v1378_v54, %v1376_v53 }
 0x5b9   : > { %1869 = vmatprep.subr.bf16.mxu1 %v1868_v57  ;;  %v1375_v57 = vld [vmem:[#allocation7 + $0x180] sm:$0xff] }
 0x5ba   : > { %v1910_v61 = vpack.c.bf16 %v1377_v58, %v1375_v57 }
 0x5bc   : > { %1871 = vmatpush1.bf16.msra.mxu1 %v1870_v62  ;;  %v1912_v62 = vpack.c.bf16 %v1382_v60, %v1380_v59 }
 0x5bd   : > { %1873 = vmatprep.subr.bf16.mxu1 %v1872_v63  ;;  %v1379_v63 = vld [vmem:[#allocation7 + $0x1a0] sm:$0xff] }
 0x5be   : > { %v1914_v3 = vpack.c.bf16 %v1381_v0, %v1379_v63 }
 0x5c0   : > { %1875 = vmatpush1.bf16.msra.mxu1 %v1874_v4  ;;  %v1916_v4 = vpack.c.bf16 %v1386_v2, %v1384_v1 }
 0x5c1   : > { %1877 = vmatprep.subr.bf16.mxu1 %v1876_v5  ;;  %v1383_v5 = vld [vmem:[#allocation7 + $0x1c0] sm:$0xff] }
 0x5c2   : > { %v1918_v7 = vpack.c.bf16 %v1385_v6, %v1383_v5 }
 0x5c4   : > { %1879 = vmatpush1.bf16.msra.mxu1 %v1878_v12  ;;  %v1920_v12 = vpack.c.bf16 %v1390_v10, %v1388_v9 }
 0x5c5   : > { %1881 = vmatprep.subr.bf16.mxu1 %v1880_v13  ;;  %v1387_v13 = vld [vmem:[#allocation7 + $0x1e0] sm:$0xff] }
 0x5c6   : > { %v1922_v17 = vpack.c.bf16 %v1389_v15, %v1387_v13 }
 0x5c8   : > { %1883 = vmatpush1.bf16.msra.mxu1 %v1882_v20 }
 0x5c9   : > { %1885 = vmatprep.subr.bf16.mxu1 %v1884_v21 }
 0x5cc   : > { %1887 = vmatpush1.bf16.msra.mxu1 %v1886_v26 }
 0x5cd   : > { %1889 = vmatprep.subr.bf16.mxu1 %v1888_v27 }
 0x5d0   : > { %1891 = vmatpush1.bf16.msra.mxu1 %v1890_v31  ;;  %v1400_v31 = vrot.slane %v1391_v29, %v1399_v30 }
 0x5d1   : > { %1893 = vmatprep.subr.bf16.mxu1 %v1892_v32 }
 0x5d4   : > { %1895 = vmatpush1.bf16.msra.mxu1 %v1894_v37 }
 0x5d5   : > { %1897 = vmatprep.subr.bf16.mxu1 %v1896_v8 }
 0x5d8   : > { %1899 = vmatpush1.bf16.msra.mxu1 %v1898_v44 }
 0x5d9   : > { %1901 = vmatprep.subr.bf16.mxu1 %v1900_v45 }
 0x5dc   : > { %1903 = vmatpush1.bf16.msra.mxu1 %v1902_v49 }
 0x5dd   : > { %1905 = vmatprep.subr.bf16.mxu1 %v1904_v50 }
 0x5e0   : > { %1907 = vmatpush1.bf16.msra.mxu1 %v1906_v55 }
 0x5e1   : > { %1909 = vmatprep.subr.bf16.mxu1 %v1908_v56 }
 0x5e4   : > { %1911 = vmatpush1.bf16.msra.mxu1 %v1910_v61 }
 0x5e5   : > { %1913 = vmatprep.subr.bf16.mxu1 %v1912_v62 }
 0x5e8   : > { %1915 = vmatpush1.bf16.msra.mxu1 %v1914_v3 }
 0x5e9   : > { %1917 = vmatprep.subr.bf16.mxu1 %v1916_v4 }
 0x5ec   : > { %1919 = vmatpush1.bf16.msra.mxu1 %v1918_v7 }
 0x5ed   : > { %1921 = vmatprep.subr.bf16.mxu1 %v1920_v12 }
 0x5f0   : > { %1923 = vmatpush1.bf16.msra.mxu1 %v1922_v17 }
 0x682   : > { %v983_v18 = vpop.f32.mrb[10].mxu0 }
 0x683   : > { %v1647_v19 = vpop.f32.mrb[11].mxu0 }
 0x686   : > { %v1313_v20 = vpop.f32.mrb[8].mxu1 }
 0x687   : > { %v1998_v21 = vpack.i.bf16 %v983_v18, %v1313_v20  ;;  %v1667_v22 = vpop.f32.mrb[9].mxu1 }
 0x689   : > { %1999 = vrot.lane.b32.xlu1 %v1998_v21, %s2186_s21 }
 0x6fb   : > { %v2000_v23 = vpop.permute.xlu1 %1999 }
 0x6fc   : > { %v2002_v24 = vunpack.i.h.bf16 %v2000_v23  ;;  %v2001_v25 = vunpack.i.l.bf16 %v2000_v23 }
 0x6fe   : > { %v1326_v26 = vsel %vm655_vm1, %v2472_v14, %v2001_v25  ;;  %v1325_v27 = vsel %vm655_vm1, %v2470_v11, %v2002_v24 }
 0x6ff   : > { %1467 = vmatprep.mubr.f32.mxu1 %v1326_v26 }
 0x700   : > { %1468 = vmatmul.mubr.f32.vlgmr.msra.gmra.mrb[10].mxu1 %v1325_v27 }
 0x7d3   : > { %v1469_v14 = vpop.f32.mrb[10].mxu1 }
 0x7d4   : > { %v1470_v11 = vadd.f32 %v1469_v14, %v1396_v16  ;;  %v1471_v32 = vpop.f32.mrb[11].mxu1 }
 0x7d5   : > { %v1472_v33 = vadd.f32 %v1471_v32, %v1400_v31 }
 0x7d6   : > { %1474 = vst [vmem:[%s242_s25] sm:$0xff] %v1470_v11 }
 0x7d7   : > { %1475 = vst [vmem:[%s242_s25 + $0x8] sm:$0xff] %v1472_v33 }
 0x7d8   : > { %2118 = shalt.err (!%p2115_p2)
}
 0x7d9   : > { %s2119_s5 = scalar_lea.hbm %s2506_s24, 256  ;;  %s2123_s10 = scalar_lea.hbm %s2554_s4, 512 }
 0x7da   : > { %p2120_p13 = scmp.ne.s32.totalorder %s2506_s24, %s2119_s5  ;;  %p2124_p4 = scmp.lt.u32.totalorder %s2506_s24, %s2554_s4 }
 0x7db   : > { %p2125_p7 = scmp.lt.u32.totalorder %s2123_s10, %s2119_s5  ;;  %p2127_p11 = scmp.lt.u32.totalorder %s2119_s5, %s2506_s24 }
 0x7dc   : > { %p2121_p6 = pnand %p2120_p13, %p2568_p0 }
 0x7dd   : > { %p2126_p8 = por %p2125_p7, %p2124_p4 }
 0x7de   : > { %p2122_p10 = pneg %p2121_p6 }
 0x7df   : > { %p2128_p1 = por %p2127_p11, %p2126_p8 }
 0x7e1   : > { %p2129_p3 = pnand %p2128_p1, %p2122_p10 }
 0x7e3   : > { %2132 = shalt.err (!%p2129_p3)
}
 0x7e4   : > { %1934 = dma.vmem_to_hbm [thread:$0]  (%p2568_p0), %s2508_s7, 256, %s2506_s24, %s1477_s19  }
 0x7e5 PF: > { %s1503_s30 = sand.u32 1, %s2163_s15   ;;  %p2569_p5 = scmp.ne.s32.totalorder %s2559_s22, 0 }
 0x7e6   : > { %p2570_p9 = scmp.ge.s32.totalorder %s2175_s18, 2  ;;  %s1504_s6 = scalar_lea.sflag [#allocation4], %s1503_s30 }
 0x7e8   : > { %p1948_p12 = pnand %p2570_p9, %p2569_p5 }
 0x7ea   : > { %2158 = dma.done.wait (!%p1948_p12), %s1504_s6, 256  }
 0x7eb   : > { %2160 = vsyncadd (!%p1948_p12), %s1504_s6, 4294967040  ;;  %p18_p2 = scmp.ge.s32.totalorder %s2323_s11, 4   ;;  %s2571_s15 = smov %s2167_s16 }
 0x7ec   : > { %s2572_s16 = smov %s2171_s17  ;;  %s2573_s17 = smov %s2332_s14 }
 0x7ed   : > { %s2574_s18 = smov %s2323_s11  ;;  %20 = sbr.rel (!%p18_p2) target bundleno = 6 (0x6), region = 89 }
 0x7f4   :  { %1509 = vsyncpa [#allocation3], 1 }
 0x7f5   :  { %1511 = vsyncpa [#allocation3 + $0x1], 1 }
 0x7f6   :  { %1512 = vsyncpa [#allocation6], 1 }
 0x7f7   :  { %1513 = vsyncpa [#allocation4], 1 }
 0x7f8   :  { %1515 = vsyncpa [#allocation4 + $0x1], 1 }

</bundles_post_ra>
